<compile_context>
chip_gen: v7x
topology: tpu7x:2x2x1
jax: 0.10.0
libtpu: 0.0.40
codegen_flags: <defaults>
</compile_context>

<pallas_src>
import jax
import jax.numpy as jnp
from jax import lax
from jax.experimental import pallas as pl
from jax.experimental.pallas import tpu as pltpu


def _round_up(x, m):
    return (x + m - 1) // m * m


# ---------------------------------------------------------------------------
# Fused kernel: folded-embedding gather + GRU recurrence, chunked over time.
# ---------------------------------------------------------------------------
def encoder_gru_kernel(ids_ref, folded_ref, w_hh_t_ref, b_hh_ref, lens_ref,
                       out_ref, hid_ref, h_sc, xg_buf):
    # ids_ref:    SMEM [S_pad*B] int32, time-major (row = t*B + b), scalar-prefetched
    # folded_ref: VMEM [V, 3Hp]  (emb_table @ W_ih.T + b_ih, per-gate padded to Hp)
    # w_hh_t_ref: VMEM [Hp, 3Hp]        b_hh_ref: VMEM [1, 3Hp]
    # lens_ref:   VMEM [B, 1] int32
    # out_ref:    VMEM [B, T_CHUNK, Hp] batch-major output block for this chunk
    # hid_ref:    VMEM [B, Hp]  resident across the grid, written on the last chunk
    # h_sc:       VMEM [B, Hp]  hidden-state carry
    # xg_buf:     VMEM [T_CHUNK*B, 3Hp] gathered gate pre-activations for the chunk
    c = pl.program_id(0)
    bsz, t_chunk, hp = out_ref.shape

    @pl.when(c == 0)
    def _():
        h_sc[...] = jnp.zeros_like(h_sc)

    # --- gather the folded-embedding rows for this time chunk (no one-hot) ----
    base = c * (t_chunk * bsz)
    for r in range(t_chunk * bsz):                 # unrolled; static dst rows
        tok = ids_ref[base + r]
        xg_buf[pl.ds(r, 1), :] = folded_ref[pl.ds(tok, 1), :]

    # --- unrolled GRU recurrence over the chunk (gate order r|z|n, torch) -----
    w_hh = w_hh_t_ref[...]                         # [Hp, 3Hp]  (hoisted loads)
    b_hh = b_hh_ref[...]                           # [1, 3Hp]
    lens = lens_ref[...]                           # [B, 1] int32
    h = h_sc[...]                                  # [B, Hp]
    for tl in range(t_chunk):
        xg = xg_buf[pl.ds(tl * bsz, bsz), :]       # [B, 3Hp], static slice
        hg = jnp.dot(h, w_hh, preferred_element_type=jnp.float32) + b_hh
        r_g = jax.nn.sigmoid(xg[:, 0:hp] + hg[:, 0:hp])
        z_g = jax.nn.sigmoid(xg[:, hp:2 * hp] + hg[:, hp:2 * hp])
        n_g = jnp.tanh(xg[:, 2 * hp:3 * hp] + r_g * hg[:, 2 * hp:3 * hp])
        h_new = (1.0 - z_g) * n_g + z_g * h
        m = (c * t_chunk + tl < lens).astype(jnp.float32)   # [B, 1] validity mask
        h = m * h_new + (1.0 - m) * h              # carry h past padding
        out_ref[:, tl, :] = h_new * m              # padded steps -> exact zeros
    h_sc[...] = h

    @pl.when(c == pl.num_programs(0) - 1)
    def _():
        hid_ref[...] = h


# ---------------------------------------------------------------------------
# Wrapper: Encoder.forward
# ---------------------------------------------------------------------------
def encoder_forward(src, src_lens, emb_table, w_ih, b_ih, w_hh, b_hh):
    """src: [B, S] int32, src_lens: python list of ints.
    emb_table: [V, E]; w_ih: [3H, E]; b_ih: [3H]; w_hh: [3H, H]; b_hh: [3H]
    (torch nn.GRU weight layouts, gate order r|z|n)."""
    B, S = src.shape
    V, _E = emb_table.shape
    H3 = w_ih.shape[0]
    H = H3 // 3
    f32 = jnp.float32

    LANE = 128
    Hp = _round_up(H, LANE)            # per-gate width padded to full lanes
    H3p = 3 * Hp

    s_pad8 = _round_up(S, 8)
    t_chunk = min(32, s_pad8)          # multiple of 8; amortizes per-grid-step cost
    S_pad = _round_up(S, t_chunk)
    n_chunks = S_pad // t_chunk

    # --- fold embedding + input projection + b_ih into one gather table -------
    folded = emb_table.astype(f32) @ w_ih.astype(f32).T + b_ih.astype(f32)[None, :]
    folded = folded.reshape(V, 3, H)
    folded_p = jnp.zeros((V, 3, Hp), f32).at[:, :, :H].set(folded).reshape(V, H3p)

    w_hh_t = w_hh.astype(f32).T.reshape(H, 3, H)
    w_hh_t_p = jnp.zeros((Hp, 3, Hp), f32).at[:H, :, :H].set(w_hh_t).reshape(Hp, H3p)
    b_hh_p = jnp.zeros((3, Hp), f32).at[:, :H].set(
        b_hh.astype(f32).reshape(3, H)).reshape(1, H3p)

    # --- token ids, time-major, padded with token 0 (masked out in-kernel) ----
    src_p = jnp.zeros((B, S_pad), jnp.int32).at[:, :S].set(src.astype(jnp.int32))
    ids_flat = jnp.transpose(src_p).reshape(S_pad * B)           # row = t*B + b
    lens2d = jnp.asarray(src_lens, dtype=jnp.int32).reshape(B, 1)

    out_p, hid_p = pl.pallas_call(
        encoder_gru_kernel,
        out_shape=(jax.ShapeDtypeStruct((B, S_pad, Hp), f32),
                   jax.ShapeDtypeStruct((B, Hp), f32)),
        grid_spec=pltpu.PrefetchScalarGridSpec(
            num_scalar_prefetch=1,
            grid=(n_chunks,),
            in_specs=[
                pl.BlockSpec((V, H3p), lambda c, ids: (0, 0)),     # folded table
                pl.BlockSpec((Hp, H3p), lambda c, ids: (0, 0)),    # W_hh^T (padded)
                pl.BlockSpec((1, H3p), lambda c, ids: (0, 0)),     # b_hh (padded)
                pl.BlockSpec((B, 1), lambda c, ids: (0, 0)),       # src_lens
            ],
            out_specs=[
                pl.BlockSpec((B, t_chunk, Hp), lambda c, ids: (0, c, 0)),
                pl.BlockSpec((B, Hp), lambda c, ids: (0, 0)),
            ],
            scratch_shapes=[
                pltpu.VMEM((B, Hp), f32),                 # hidden-state carry
                pltpu.VMEM((t_chunk * B, H3p), f32),      # gathered gates (chunk)
            ],
        ),
        compiler_params=pltpu.CompilerParams(
            dimension_semantics=("arbitrary",)),
    )(ids_flat, folded_p, w_hh_t_p, b_hh_p, lens2d)

    t_out = int(max(src_lens))         # pad_packed_sequence trims to max length
    return out_p[:, :t_out, :H], hid_p[None, :, :H]


# ---------------------------------------------------------------------------
# Pure-JAX reference (mirrors the PyTorch Encoder with a GRU)
# ---------------------------------------------------------------------------
def encoder_reference(src, src_lens, emb_table, w_ih, b_ih, w_hh, b_hh):
    B, S = src.shape
    H = w_hh.shape[1]
    lens = jnp.asarray(src_lens, dtype=jnp.int32)
    emb = emb_table[src]                                        # [B, S, E]
    xg = emb @ w_ih.T + b_ih                                    # [B, S, 3H]
    mask = (jnp.arange(S)[None, :] < lens[:, None]).astype(jnp.float32)

    def step(h, inp):
        xg_t, m_t = inp                                         # [B, 3H], [B, 1]
        hg = h @ w_hh.T + b_hh
        r = jax.nn.sigmoid(xg_t[:, :H] + hg[:, :H])
        z = jax.nn.sigmoid(xg_t[:, H:2 * H] + hg[:, H:2 * H])
        n = jnp.tanh(xg_t[:, 2 * H:] + r * hg[:, 2 * H:])
        h_new = (1.0 - z) * n + z * h
        h_next = m_t * h_new + (1.0 - m_t) * h
        return h_next, h_new * m_t

    h0 = jnp.zeros((B, H), jnp.float32)
    h_last, outs = lax.scan(step, h0, (jnp.swapaxes(xg, 0, 1), mask.T[:, :, None]))
    outputs = jnp.swapaxes(outs, 0, 1)                          # [B, S, H]
    t_out = int(max(src_lens))
    return outputs[:, :t_out, :], h_last[None]


if __name__ == "__main__":
    INPUT_DIM, EMB_DIM, HIDDEN_DIM = 64, 32, 32     # vocab, emb, hidden
    NUM_LAYERS, CELL_TYPE = 1, "GRU"
    B, S = 2, 8
    src_lens = [8, 5]

    key = jax.random.PRNGKey(0)
    k_src, k_emb, k_wih, k_bih, k_whh, k_bhh = jax.random.split(key, 6)

    src = jax.random.randint(k_src, (B, S), 0, INPUT_DIM, dtype=jnp.int32)
    pad_valid = jnp.arange(S)[None, :] < jnp.asarray(src_lens)[:, None]
    src = jnp.where(pad_valid, src, 0)              # pad token = 0 past each length

    emb_table = jax.random.normal(k_emb, (INPUT_DIM, EMB_DIM), dtype=jnp.float32)
    bound = 1.0 / float(HIDDEN_DIM) ** 0.5          # torch GRU default init range
    w_ih = jax.random.uniform(k_wih, (3 * HIDDEN_DIM, EMB_DIM),
                              minval=-bound, maxval=bound, dtype=jnp.float32)
    b_ih = jax.random.uniform(k_bih, (3 * HIDDEN_DIM,),
                              minval=-bound, maxval=bound, dtype=jnp.float32)
    w_hh = jax.random.uniform(k_whh, (3 * HIDDEN_DIM, HIDDEN_DIM),
                              minval=-bound, maxval=bound, dtype=jnp.float32)
    b_hh = jax.random.uniform(k_bhh, (3 * HIDDEN_DIM,),
                              minval=-bound, maxval=bound, dtype=jnp.float32)

    out, hid = encoder_forward(src, src_lens, emb_table, w_ih, b_ih, w_hh, b_hh)
    out = jax.block_until_ready(out)
    hid = jax.block_until_ready(hid)

    ref_out, ref_hid = encoder_reference(src, src_lens, emb_table,
                                         w_ih, b_ih, w_hh, b_hh)

    assert out.shape == (B, max(src_lens), HIDDEN_DIM), out.shape
    assert hid.shape == (NUM_LAYERS, B, HIDDEN_DIM), hid.shape
    assert jnp.allclose(out, ref_out, atol=1e-4, rtol=1e-4), "output mismatch vs reference"
    assert jnp.allclose(hid, ref_hid, atol=1e-4, rtol=1e-4), "hidden mismatch vs reference"
    # pad_packed_sequence semantics: padded positions are exactly zero
    assert jnp.all(out[1, src_lens[1]:, :] == 0.0), "padded outputs must be zero"

    print("KERNEL_OK")
</pallas_src>

<mosaic_0001>
module attributes {stable_mosaic.version = 11 : i64} {
  func.func @encoder_gru_kernel(%arg0: i32, %arg1: memref<16xi32, #tpu.memory_space<smem>>, %arg2: memref<64x384xf32, #tpu.memory_space<vmem>>, %arg3: memref<128x384xf32, #tpu.memory_space<vmem>>, %arg4: memref<1x384xf32, #tpu.memory_space<vmem>>, %arg5: memref<2x1xi32, #tpu.memory_space<vmem>>, %arg6: memref<2x8x128xf32, #tpu.memory_space<vmem>>, %arg7: memref<2x128xf32, #tpu.memory_space<vmem>>, %arg8: memref<2x128xf32, #tpu.memory_space<vmem>>, %arg9: memref<16x384xf32, #tpu.memory_space<vmem>>) attributes {dimension_semantics = [#tpu.dimension_semantics<arbitrary>], iteration_bounds = array<i64: 1>, scalar_prefetch = 1 : i64, scratch_operands = 2 : i64, tpu.core_type = #tpu.core_type<tc>, window_params = [{pipeline_mode = #tpu.pipeline_mode<synchronous>, transform_indices = @transform_0, window_bounds = array<i64: 64, 384>}, {pipeline_mode = #tpu.pipeline_mode<synchronous>, transform_indices = @transform_1, window_bounds = array<i64: 128, 384>}, {pipeline_mode = #tpu.pipeline_mode<synchronous>, transform_indices = @transform_2, window_bounds = array<i64: 1, 384>}, {pipeline_mode = #tpu.pipeline_mode<synchronous>, transform_indices = @transform_3, window_bounds = array<i64: 2, 1>}, {transform_indices = @transform_4, window_bounds = array<i64: 2, 8, 128>}, {pipeline_mode = #tpu.pipeline_mode<synchronous>, transform_indices = @transform_5, window_bounds = array<i64: 2, 128>}]} {
    %c0_i32 = arith.constant 0 : i32
    %0 = arith.cmpi eq, %arg0, %c0_i32 : i32
    %1 = arith.extui %0 : i1 to i32
    %c0_i32_0 = arith.constant 0 : i32
    %2 = arith.cmpi ne, %1, %c0_i32_0 : i32
    scf.if %2 {
      %cst_141 = arith.constant 0.000000e+00 : f32
      %492 = vector.broadcast %cst_141 : f32 to vector<2x128xf32>
      %c0_142 = arith.constant 0 : index
      %c0_143 = arith.constant 0 : index
      %493 = vector.load %arg8[%c0_142, %c0_143] : memref<2x128xf32, #tpu.memory_space<vmem>>, vector<2x128xf32>
      tpu.vector_store %arg8[%c0_142, %c0_143], %492 {strides = array<i32>} : memref<2x128xf32, #tpu.memory_space<vmem>>, vector<2x128xf32>,
    } else {
    }
    %c16_i32 = arith.constant 16 : i32
    %3 = arith.muli %arg0, %c16_i32 : i32
    %c0_i32_1 = arith.constant 0 : i32
    %4 = arith.addi %3, %c0_i32_1 : i32
    %5 = arith.index_cast %4 : i32 to index
    %6 = memref.load %arg1[%5] : memref<16xi32, #tpu.memory_space<smem>>
    %7 = arith.index_cast %6 : i32 to index
    %c0 = arith.constant 0 : index
    %8 = vector.load %arg2[%7, %c0] : memref<64x384xf32, #tpu.memory_space<vmem>>, vector<1x384xf32>
    %c0_2 = arith.constant 0 : index
    %c0_3 = arith.constant 0 : index
    %9 = vector.load %arg9[%c0_2, %c0_3] : memref<16x384xf32, #tpu.memory_space<vmem>>, vector<1x384xf32>
    tpu.vector_store %arg9[%c0_2, %c0_3], %8 {strides = array<i32>} : memref<16x384xf32, #tpu.memory_space<vmem>>, vector<1x384xf32>,
    %c1_i32 = arith.constant 1 : i32
    %10 = arith.addi %3, %c1_i32 : i32
    %11 = arith.index_cast %10 : i32 to index
    %12 = memref.load %arg1[%11] : memref<16xi32, #tpu.memory_space<smem>>
    %13 = arith.index_cast %12 : i32 to index
    %c0_4 = arith.constant 0 : index
    %14 = vector.load %arg2[%13, %c0_4] : memref<64x384xf32, #tpu.memory_space<vmem>>, vector<1x384xf32>
    %c1 = arith.constant 1 : index
    %c0_5 = arith.constant 0 : index
    %15 = vector.load %arg9[%c1, %c0_5] : memref<16x384xf32, #tpu.memory_space<vmem>>, vector<1x384xf32>
    tpu.vector_store %arg9[%c1, %c0_5], %14 {strides = array<i32>} : memref<16x384xf32, #tpu.memory_space<vmem>>, vector<1x384xf32>,
    %c2_i32 = arith.constant 2 : i32
    %16 = arith.addi %3, %c2_i32 : i32
    %17 = arith.index_cast %16 : i32 to index
    %18 = memref.load %arg1[%17] : memref<16xi32, #tpu.memory_space<smem>>
    %19 = arith.index_cast %18 : i32 to index
    %c0_6 = arith.constant 0 : index
    %20 = vector.load %arg2[%19, %c0_6] : memref<64x384xf32, #tpu.memory_space<vmem>>, vector<1x384xf32>
    %c2 = arith.constant 2 : index
    %c0_7 = arith.constant 0 : index
    %21 = vector.load %arg9[%c2, %c0_7] : memref<16x384xf32, #tpu.memory_space<vmem>>, vector<1x384xf32>
    tpu.vector_store %arg9[%c2, %c0_7], %20 {strides = array<i32>} : memref<16x384xf32, #tpu.memory_space<vmem>>, vector<1x384xf32>,
    %c3_i32 = arith.constant 3 : i32
    %22 = arith.addi %3, %c3_i32 : i32
    %23 = arith.index_cast %22 : i32 to index
    %24 = memref.load %arg1[%23] : memref<16xi32, #tpu.memory_space<smem>>
    %25 = arith.index_cast %24 : i32 to index
    %c0_8 = arith.constant 0 : index
    %26 = vector.load %arg2[%25, %c0_8] : memref<64x384xf32, #tpu.memory_space<vmem>>, vector<1x384xf32>
    %c3 = arith.constant 3 : index
    %c0_9 = arith.constant 0 : index
    %27 = vector.load %arg9[%c3, %c0_9] : memref<16x384xf32, #tpu.memory_space<vmem>>, vector<1x384xf32>
    tpu.vector_store %arg9[%c3, %c0_9], %26 {strides = array<i32>} : memref<16x384xf32, #tpu.memory_space<vmem>>, vector<1x384xf32>,
    %c4_i32 = arith.constant 4 : i32
    %28 = arith.addi %3, %c4_i32 : i32
    %29 = arith.index_cast %28 : i32 to index
    %30 = memref.load %arg1[%29] : memref<16xi32, #tpu.memory_space<smem>>
    %31 = arith.index_cast %30 : i32 to index
    %c0_10 = arith.constant 0 : index
    %32 = vector.load %arg2[%31, %c0_10] : memref<64x384xf32, #tpu.memory_space<vmem>>, vector<1x384xf32>
    %c4 = arith.constant 4 : index
    %c0_11 = arith.constant 0 : index
    %33 = vector.load %arg9[%c4, %c0_11] : memref<16x384xf32, #tpu.memory_space<vmem>>, vector<1x384xf32>
    tpu.vector_store %arg9[%c4, %c0_11], %32 {strides = array<i32>} : memref<16x384xf32, #tpu.memory_space<vmem>>, vector<1x384xf32>,
    %c5_i32 = arith.constant 5 : i32
    %34 = arith.addi %3, %c5_i32 : i32
    %35 = arith.index_cast %34 : i32 to index
    %36 = memref.load %arg1[%35] : memref<16xi32, #tpu.memory_space<smem>>
    %37 = arith.index_cast %36 : i32 to index
    %c0_12 = arith.constant 0 : index
    %38 = vector.load %arg2[%37, %c0_12] : memref<64x384xf32, #tpu.memory_space<vmem>>, vector<1x384xf32>
    %c5 = arith.constant 5 : index
    %c0_13 = arith.constant 0 : index
    %39 = vector.load %arg9[%c5, %c0_13] : memref<16x384xf32, #tpu.memory_space<vmem>>, vector<1x384xf32>
    tpu.vector_store %arg9[%c5, %c0_13], %38 {strides = array<i32>} : memref<16x384xf32, #tpu.memory_space<vmem>>, vector<1x384xf32>,
    %c6_i32 = arith.constant 6 : i32
    %40 = arith.addi %3, %c6_i32 : i32
    %41 = arith.index_cast %40 : i32 to index
    %42 = memref.load %arg1[%41] : memref<16xi32, #tpu.memory_space<smem>>
    %43 = arith.index_cast %42 : i32 to index
    %c0_14 = arith.constant 0 : index
    %44 = vector.load %arg2[%43, %c0_14] : memref<64x384xf32, #tpu.memory_space<vmem>>, vector<1x384xf32>
    %c6 = arith.constant 6 : index
    %c0_15 = arith.constant 0 : index
    %45 = vector.load %arg9[%c6, %c0_15] : memref<16x384xf32, #tpu.memory_space<vmem>>, vector<1x384xf32>
    tpu.vector_store %arg9[%c6, %c0_15], %44 {strides = array<i32>} : memref<16x384xf32, #tpu.memory_space<vmem>>, vector<1x384xf32>,
    %c7_i32 = arith.constant 7 : i32
    %46 = arith.addi %3, %c7_i32 : i32
    %47 = arith.index_cast %46 : i32 to index
    %48 = memref.load %arg1[%47] : memref<16xi32, #tpu.memory_space<smem>>
    %49 = arith.index_cast %48 : i32 to index
    %c0_16 = arith.constant 0 : index
    %50 = vector.load %arg2[%49, %c0_16] : memref<64x384xf32, #tpu.memory_space<vmem>>, vector<1x384xf32>
    %c7 = arith.constant 7 : index
    %c0_17 = arith.constant 0 : index
    %51 = vector.load %arg9[%c7, %c0_17] : memref<16x384xf32, #tpu.memory_space<vmem>>, vector<1x384xf32>
    tpu.vector_store %arg9[%c7, %c0_17], %50 {strides = array<i32>} : memref<16x384xf32, #tpu.memory_space<vmem>>, vector<1x384xf32>,
    %c8_i32 = arith.constant 8 : i32
    %52 = arith.addi %3, %c8_i32 : i32
    %53 = arith.index_cast %52 : i32 to index
    %54 = memref.load %arg1[%53] : memref<16xi32, #tpu.memory_space<smem>>
    %55 = arith.index_cast %54 : i32 to index
    %c0_18 = arith.constant 0 : index
    %56 = vector.load %arg2[%55, %c0_18] : memref<64x384xf32, #tpu.memory_space<vmem>>, vector<1x384xf32>
    %c8 = arith.constant 8 : index
    %c0_19 = arith.constant 0 : index
    %57 = vector.load %arg9[%c8, %c0_19] : memref<16x384xf32, #tpu.memory_space<vmem>>, vector<1x384xf32>
    tpu.vector_store %arg9[%c8, %c0_19], %56 {strides = array<i32>} : memref<16x384xf32, #tpu.memory_space<vmem>>, vector<1x384xf32>,
    %c9_i32 = arith.constant 9 : i32
    %58 = arith.addi %3, %c9_i32 : i32
    %59 = arith.index_cast %58 : i32 to index
    %60 = memref.load %arg1[%59] : memref<16xi32, #tpu.memory_space<smem>>
    %61 = arith.index_cast %60 : i32 to index
    %c0_20 = arith.constant 0 : index
    %62 = vector.load %arg2[%61, %c0_20] : memref<64x384xf32, #tpu.memory_space<vmem>>, vector<1x384xf32>
    %c9 = arith.constant 9 : index
    %c0_21 = arith.constant 0 : index
    %63 = vector.load %arg9[%c9, %c0_21] : memref<16x384xf32, #tpu.memory_space<vmem>>, vector<1x384xf32>
    tpu.vector_store %arg9[%c9, %c0_21], %62 {strides = array<i32>} : memref<16x384xf32, #tpu.memory_space<vmem>>, vector<1x384xf32>,
    %c10_i32 = arith.constant 10 : i32
    %64 = arith.addi %3, %c10_i32 : i32
    %65 = arith.index_cast %64 : i32 to index
    %66 = memref.load %arg1[%65] : memref<16xi32, #tpu.memory_space<smem>>
    %67 = arith.index_cast %66 : i32 to index
    %c0_22 = arith.constant 0 : index
    %68 = vector.load %arg2[%67, %c0_22] : memref<64x384xf32, #tpu.memory_space<vmem>>, vector<1x384xf32>
    %c10 = arith.constant 10 : index
    %c0_23 = arith.constant 0 : index
    %69 = vector.load %arg9[%c10, %c0_23] : memref<16x384xf32, #tpu.memory_space<vmem>>, vector<1x384xf32>
    tpu.vector_store %arg9[%c10, %c0_23], %68 {strides = array<i32>} : memref<16x384xf32, #tpu.memory_space<vmem>>, vector<1x384xf32>,
    %c11_i32 = arith.constant 11 : i32
    %70 = arith.addi %3, %c11_i32 : i32
    %71 = arith.index_cast %70 : i32 to index
    %72 = memref.load %arg1[%71] : memref<16xi32, #tpu.memory_space<smem>>
    %73 = arith.index_cast %72 : i32 to index
    %c0_24 = arith.constant 0 : index
    %74 = vector.load %arg2[%73, %c0_24] : memref<64x384xf32, #tpu.memory_space<vmem>>, vector<1x384xf32>
    %c11 = arith.constant 11 : index
    %c0_25 = arith.constant 0 : index
    %75 = vector.load %arg9[%c11, %c0_25] : memref<16x384xf32, #tpu.memory_space<vmem>>, vector<1x384xf32>
    tpu.vector_store %arg9[%c11, %c0_25], %74 {strides = array<i32>} : memref<16x384xf32, #tpu.memory_space<vmem>>, vector<1x384xf32>,
    %c12_i32 = arith.constant 12 : i32
    %76 = arith.addi %3, %c12_i32 : i32
    %77 = arith.index_cast %76 : i32 to index
    %78 = memref.load %arg1[%77] : memref<16xi32, #tpu.memory_space<smem>>
    %79 = arith.index_cast %78 : i32 to index
    %c0_26 = arith.constant 0 : index
    %80 = vector.load %arg2[%79, %c0_26] : memref<64x384xf32, #tpu.memory_space<vmem>>, vector<1x384xf32>
    %c12 = arith.constant 12 : index
    %c0_27 = arith.constant 0 : index
    %81 = vector.load %arg9[%c12, %c0_27] : memref<16x384xf32, #tpu.memory_space<vmem>>, vector<1x384xf32>
    tpu.vector_store %arg9[%c12, %c0_27], %80 {strides = array<i32>} : memref<16x384xf32, #tpu.memory_space<vmem>>, vector<1x384xf32>,
    %c13_i32 = arith.constant 13 : i32
    %82 = arith.addi %3, %c13_i32 : i32
    %83 = arith.index_cast %82 : i32 to index
    %84 = memref.load %arg1[%83] : memref<16xi32, #tpu.memory_space<smem>>
    %85 = arith.index_cast %84 : i32 to index
    %c0_28 = arith.constant 0 : index
    %86 = vector.load %arg2[%85, %c0_28] : memref<64x384xf32, #tpu.memory_space<vmem>>, vector<1x384xf32>
    %c13 = arith.constant 13 : index
    %c0_29 = arith.constant 0 : index
    %87 = vector.load %arg9[%c13, %c0_29] : memref<16x384xf32, #tpu.memory_space<vmem>>, vector<1x384xf32>
    tpu.vector_store %arg9[%c13, %c0_29], %86 {strides = array<i32>} : memref<16x384xf32, #tpu.memory_space<vmem>>, vector<1x384xf32>,
    %c14_i32 = arith.constant 14 : i32
    %88 = arith.addi %3, %c14_i32 : i32
    %89 = arith.index_cast %88 : i32 to index
    %90 = memref.load %arg1[%89] : memref<16xi32, #tpu.memory_space<smem>>
    %91 = arith.index_cast %90 : i32 to index
    %c0_30 = arith.constant 0 : index
    %92 = vector.load %arg2[%91, %c0_30] : memref<64x384xf32, #tpu.memory_space<vmem>>, vector<1x384xf32>
    %c14 = arith.constant 14 : index
    %c0_31 = arith.constant 0 : index
    %93 = vector.load %arg9[%c14, %c0_31] : memref<16x384xf32, #tpu.memory_space<vmem>>, vector<1x384xf32>
    tpu.vector_store %arg9[%c14, %c0_31], %92 {strides = array<i32>} : memref<16x384xf32, #tpu.memory_space<vmem>>, vector<1x384xf32>,
    %c15_i32 = arith.constant 15 : i32
    %94 = arith.addi %3, %c15_i32 : i32
    %95 = arith.index_cast %94 : i32 to index
    %96 = memref.load %arg1[%95] : memref<16xi32, #tpu.memory_space<smem>>
    %97 = arith.index_cast %96 : i32 to index
    %c0_32 = arith.constant 0 : index
    %98 = vector.load %arg2[%97, %c0_32] : memref<64x384xf32, #tpu.memory_space<vmem>>, vector<1x384xf32>
    %c15 = arith.constant 15 : index
    %c0_33 = arith.constant 0 : index
    %99 = vector.load %arg9[%c15, %c0_33] : memref<16x384xf32, #tpu.memory_space<vmem>>, vector<1x384xf32>
    tpu.vector_store %arg9[%c15, %c0_33], %98 {strides = array<i32>} : memref<16x384xf32, #tpu.memory_space<vmem>>, vector<1x384xf32>,
    %c0_34 = arith.constant 0 : index
    %c0_35 = arith.constant 0 : index
    %100 = vector.load %arg3[%c0_34, %c0_35] : memref<128x384xf32, #tpu.memory_space<vmem>>, vector<128x384xf32>
    %c0_36 = arith.constant 0 : index
    %c0_37 = arith.constant 0 : index
    %101 = vector.load %arg4[%c0_36, %c0_37] : memref<1x384xf32, #tpu.memory_space<vmem>>, vector<1x384xf32>
    %c0_38 = arith.constant 0 : index
    %c0_39 = arith.constant 0 : index
    %102 = vector.load %arg5[%c0_38, %c0_39] : memref<2x1xi32, #tpu.memory_space<vmem>>, vector<2x1xi32>
    %c0_40 = arith.constant 0 : index
    %c0_41 = arith.constant 0 : index
    %103 = vector.load %arg8[%c0_40, %c0_41] : memref<2x128xf32, #tpu.memory_space<vmem>>, vector<2x128xf32>
    %c0_42 = arith.constant 0 : index
    %c0_43 = arith.constant 0 : index
    %104 = vector.load %arg9[%c0_42, %c0_43] : memref<16x384xf32, #tpu.memory_space<vmem>>, vector<2x384xf32>
    %cst = arith.constant dense<0.000000e+00> : vector<2x384xf32>
    %105 = tpu.matmul %103, %100, %cst {dimension_numbers = #tpu.dot_dimension_numbers<[1], [0], [0], [1], [0, 0, 1, 1], [], []>} : vector<2x128xf32>, vector<128x384xf32>, vector<2x384xf32> -> vector<2x384xf32>
    %106 = vector.broadcast %101 : vector<1x384xf32> to vector<2x384xf32>
    %107 = arith.addf %105, %106 : vector<2x384xf32>
    %108 = vector.extract_strided_slice %104 {offsets = [0, 0], sizes = [2, 128], strides = [1, 1]} : vector<2x384xf32> to vector<2x128xf32>
    %109 = vector.extract_strided_slice %107 {offsets = [0, 0], sizes = [2, 128], strides = [1, 1]} : vector<2x384xf32> to vector<2x128xf32>
    %110 = arith.addf %108, %109 : vector<2x128xf32>
    %111 = arith.negf %110 : vector<2x128xf32>
    %112 = math.exp %111 : vector<2x128xf32>
    %cst_44 = arith.constant 1.000000e+00 : f32
    %113 = vector.broadcast %cst_44 : f32 to vector<2x128xf32>
    %114 = arith.addf %113, %112 : vector<2x128xf32>
    %115 = arith.divf %113, %114 : vector<2x128xf32>
    %116 = vector.extract_strided_slice %104 {offsets = [0, 128], sizes = [2, 128], strides = [1, 1]} : vector<2x384xf32> to vector<2x128xf32>
    %117 = vector.extract_strided_slice %107 {offsets = [0, 128], sizes = [2, 128], strides = [1, 1]} : vector<2x384xf32> to vector<2x128xf32>
    %118 = arith.addf %116, %117 : vector<2x128xf32>
    %119 = arith.negf %118 : vector<2x128xf32>
    %120 = math.exp %119 : vector<2x128xf32>
    %cst_45 = arith.constant 1.000000e+00 : f32
    %121 = vector.broadcast %cst_45 : f32 to vector<2x128xf32>
    %122 = arith.addf %121, %120 : vector<2x128xf32>
    %123 = arith.divf %121, %122 : vector<2x128xf32>
    %124 = vector.extract_strided_slice %104 {offsets = [0, 256], sizes = [2, 128], strides = [1, 1]} : vector<2x384xf32> to vector<2x128xf32>
    %125 = vector.extract_strided_slice %107 {offsets = [0, 256], sizes = [2, 128], strides = [1, 1]} : vector<2x384xf32> to vector<2x128xf32>
    %126 = arith.mulf %115, %125 : vector<2x128xf32>
    %127 = arith.addf %124, %126 : vector<2x128xf32>
    %128 = math.tanh %127 : vector<2x128xf32>
    %cst_46 = arith.constant 1.000000e+00 : f32
    %129 = vector.broadcast %cst_46 : f32 to vector<2x128xf32>
    %130 = arith.subf %129, %123 : vector<2x128xf32>
    %131 = arith.mulf %130, %128 : vector<2x128xf32>
    %132 = arith.mulf %123, %103 : vector<2x128xf32>
    %133 = arith.addf %131, %132 : vector<2x128xf32>
    %c8_i32_47 = arith.constant 8 : i32
    %134 = arith.muli %arg0, %c8_i32_47 : i32
    %c0_i32_48 = arith.constant 0 : i32
    %135 = arith.addi %134, %c0_i32_48 : i32
    %136 = vector.broadcast %135 : i32 to vector<2x1xi32>
    %137 = arith.cmpi slt, %136, %102 : vector<2x1xi32>
    %138 = arith.extui %137 : vector<2x1xi1> to vector<2x1xi32>
    %139 = arith.sitofp %138 : vector<2x1xi32> to vector<2x1xf32>
    %140 = vector.broadcast %139 : vector<2x1xf32> to vector<2x128xf32>
    %141 = arith.mulf %140, %133 : vector<2x128xf32>
    %cst_49 = arith.constant 1.000000e+00 : f32
    %142 = vector.broadcast %cst_49 : f32 to vector<2x1xf32>
    %143 = arith.subf %142, %139 : vector<2x1xf32>
    %144 = vector.broadcast %143 : vector<2x1xf32> to vector<2x128xf32>
    %145 = arith.mulf %144, %103 : vector<2x128xf32>
    %146 = arith.addf %141, %145 : vector<2x128xf32>
    %147 = vector.broadcast %139 : vector<2x1xf32> to vector<2x128xf32>
    %148 = arith.mulf %133, %147 : vector<2x128xf32>
    %c0_50 = arith.constant 0 : index
    %c0_51 = arith.constant 0 : index
    %c0_52 = arith.constant 0 : index
    %149 = vector.load %arg6[%c0_50, %c0_51, %c0_52] : memref<2x8x128xf32, #tpu.memory_space<vmem>>, vector<2x1x128xf32>
    %150 = vector.shape_cast %149 : vector<2x1x128xf32> to vector<2x128xf32>
    %151 = vector.shape_cast %148 : vector<2x128xf32> to vector<2x1x128xf32>
    tpu.vector_store %arg6[%c0_50, %c0_51, %c0_52], %151 {strides = array<i32>} : memref<2x8x128xf32, #tpu.memory_space<vmem>>, vector<2x1x128xf32>,
    %c2_53 = arith.constant 2 : index
    %c0_54 = arith.constant 0 : index
    %152 = vector.load %arg9[%c2_53, %c0_54] : memref<16x384xf32, #tpu.memory_space<vmem>>, vector<2x384xf32>
    %cst_55 = arith.constant dense<0.000000e+00> : vector<2x384xf32>
    %153 = tpu.matmul %146, %100, %cst_55 {dimension_numbers = #tpu.dot_dimension_numbers<[1], [0], [0], [1], [0, 0, 1, 1], [], []>} : vector<2x128xf32>, vector<128x384xf32>, vector<2x384xf32> -> vector<2x384xf32>
    %154 = vector.broadcast %101 : vector<1x384xf32> to vector<2x384xf32>
    %155 = arith.addf %153, %154 : vector<2x384xf32>
    %156 = vector.extract_strided_slice %152 {offsets = [0, 0], sizes = [2, 128], strides = [1, 1]} : vector<2x384xf32> to vector<2x128xf32>
    %157 = vector.extract_strided_slice %155 {offsets = [0, 0], sizes = [2, 128], strides = [1, 1]} : vector<2x384xf32> to vector<2x128xf32>
    %158 = arith.addf %156, %157 : vector<2x128xf32>
    %159 = arith.negf %158 : vector<2x128xf32>
    %160 = math.exp %159 : vector<2x128xf32>
    %cst_56 = arith.constant 1.000000e+00 : f32
    %161 = vector.broadcast %cst_56 : f32 to vector<2x128xf32>
    %162 = arith.addf %161, %160 : vector<2x128xf32>
    %163 = arith.divf %161, %162 : vector<2x128xf32>
    %164 = vector.extract_strided_slice %152 {offsets = [0, 128], sizes = [2, 128], strides = [1, 1]} : vector<2x384xf32> to vector<2x128xf32>
    %165 = vector.extract_strided_slice %155 {offsets = [0, 128], sizes = [2, 128], strides = [1, 1]} : vector<2x384xf32> to vector<2x128xf32>
    %166 = arith.addf %164, %165 : vector<2x128xf32>
    %167 = arith.negf %166 : vector<2x128xf32>
    %168 = math.exp %167 : vector<2x128xf32>
    %cst_57 = arith.constant 1.000000e+00 : f32
    %169 = vector.broadcast %cst_57 : f32 to vector<2x128xf32>
    %170 = arith.addf %169, %168 : vector<2x128xf32>
    %171 = arith.divf %169, %170 : vector<2x128xf32>
    %172 = vector.extract_strided_slice %152 {offsets = [0, 256], sizes = [2, 128], strides = [1, 1]} : vector<2x384xf32> to vector<2x128xf32>
    %173 = vector.extract_strided_slice %155 {offsets = [0, 256], sizes = [2, 128], strides = [1, 1]} : vector<2x384xf32> to vector<2x128xf32>
    %174 = arith.mulf %163, %173 : vector<2x128xf32>
    %175 = arith.addf %172, %174 : vector<2x128xf32>
    %176 = math.tanh %175 : vector<2x128xf32>
    %cst_58 = arith.constant 1.000000e+00 : f32
    %177 = vector.broadcast %cst_58 : f32 to vector<2x128xf32>
    %178 = arith.subf %177, %171 : vector<2x128xf32>
    %179 = arith.mulf %178, %176 : vector<2x128xf32>
    %180 = arith.mulf %171, %146 : vector<2x128xf32>
    %181 = arith.addf %179, %180 : vector<2x128xf32>
    %c8_i32_59 = arith.constant 8 : i32
    %182 = arith.muli %arg0, %c8_i32_59 : i32
    %c1_i32_60 = arith.constant 1 : i32
    %183 = arith.addi %182, %c1_i32_60 : i32
    %184 = vector.broadcast %183 : i32 to vector<2x1xi32>
    %185 = arith.cmpi slt, %184, %102 : vector<2x1xi32>
    %186 = arith.extui %185 : vector<2x1xi1> to vector<2x1xi32>
    %187 = arith.sitofp %186 : vector<2x1xi32> to vector<2x1xf32>
    %188 = vector.broadcast %187 : vector<2x1xf32> to vector<2x128xf32>
    %189 = arith.mulf %188, %181 : vector<2x128xf32>
    %cst_61 = arith.constant 1.000000e+00 : f32
    %190 = vector.broadcast %cst_61 : f32 to vector<2x1xf32>
    %191 = arith.subf %190, %187 : vector<2x1xf32>
    %192 = vector.broadcast %191 : vector<2x1xf32> to vector<2x128xf32>
    %193 = arith.mulf %192, %146 : vector<2x128xf32>
    %194 = arith.addf %189, %193 : vector<2x128xf32>
    %195 = vector.broadcast %187 : vector<2x1xf32> to vector<2x128xf32>
    %196 = arith.mulf %181, %195 : vector<2x128xf32>
    %c0_62 = arith.constant 0 : index
    %c1_63 = arith.constant 1 : index
    %c0_64 = arith.constant 0 : index
    %197 = vector.load %arg6[%c0_62, %c1_63, %c0_64] : memref<2x8x128xf32, #tpu.memory_space<vmem>>, vector<2x1x128xf32>
    %198 = vector.shape_cast %197 : vector<2x1x128xf32> to vector<2x128xf32>
    %199 = vector.shape_cast %196 : vector<2x128xf32> to vector<2x1x128xf32>
    tpu.vector_store %arg6[%c0_62, %c1_63, %c0_64], %199 {strides = array<i32>} : memref<2x8x128xf32, #tpu.memory_space<vmem>>, vector<2x1x128xf32>,
    %c4_65 = arith.constant 4 : index
    %c0_66 = arith.constant 0 : index
    %200 = vector.load %arg9[%c4_65, %c0_66] : memref<16x384xf32, #tpu.memory_space<vmem>>, vector<2x384xf32>
    %cst_67 = arith.constant dense<0.000000e+00> : vector<2x384xf32>
    %201 = tpu.matmul %194, %100, %cst_67 {dimension_numbers = #tpu.dot_dimension_numbers<[1], [0], [0], [1], [0, 0, 1, 1], [], []>} : vector<2x128xf32>, vector<128x384xf32>, vector<2x384xf32> -> vector<2x384xf32>
    %202 = vector.broadcast %101 : vector<1x384xf32> to vector<2x384xf32>
    %203 = arith.addf %201, %202 : vector<2x384xf32>
    %204 = vector.extract_strided_slice %200 {offsets = [0, 0], sizes = [2, 128], strides = [1, 1]} : vector<2x384xf32> to vector<2x128xf32>
    %205 = vector.extract_strided_slice %203 {offsets = [0, 0], sizes = [2, 128], strides = [1, 1]} : vector<2x384xf32> to vector<2x128xf32>
    %206 = arith.addf %204, %205 : vector<2x128xf32>
    %207 = arith.negf %206 : vector<2x128xf32>
    %208 = math.exp %207 : vector<2x128xf32>
    %cst_68 = arith.constant 1.000000e+00 : f32
    %209 = vector.broadcast %cst_68 : f32 to vector<2x128xf32>
    %210 = arith.addf %209, %208 : vector<2x128xf32>
    %211 = arith.divf %209, %210 : vector<2x128xf32>
    %212 = vector.extract_strided_slice %200 {offsets = [0, 128], sizes = [2, 128], strides = [1, 1]} : vector<2x384xf32> to vector<2x128xf32>
    %213 = vector.extract_strided_slice %203 {offsets = [0, 128], sizes = [2, 128], strides = [1, 1]} : vector<2x384xf32> to vector<2x128xf32>
    %214 = arith.addf %212, %213 : vector<2x128xf32>
    %215 = arith.negf %214 : vector<2x128xf32>
    %216 = math.exp %215 : vector<2x128xf32>
    %cst_69 = arith.constant 1.000000e+00 : f32
    %217 = vector.broadcast %cst_69 : f32 to vector<2x128xf32>
    %218 = arith.addf %217, %216 : vector<2x128xf32>
    %219 = arith.divf %217, %218 : vector<2x128xf32>
    %220 = vector.extract_strided_slice %200 {offsets = [0, 256], sizes = [2, 128], strides = [1, 1]} : vector<2x384xf32> to vector<2x128xf32>
    %221 = vector.extract_strided_slice %203 {offsets = [0, 256], sizes = [2, 128], strides = [1, 1]} : vector<2x384xf32> to vector<2x128xf32>
    %222 = arith.mulf %211, %221 : vector<2x128xf32>
    %223 = arith.addf %220, %222 : vector<2x128xf32>
    %224 = math.tanh %223 : vector<2x128xf32>
    %cst_70 = arith.constant 1.000000e+00 : f32
    %225 = vector.broadcast %cst_70 : f32 to vector<2x128xf32>
    %226 = arith.subf %225, %219 : vector<2x128xf32>
    %227 = arith.mulf %226, %224 : vector<2x128xf32>
    %228 = arith.mulf %219, %194 : vector<2x128xf32>
    %229 = arith.addf %227, %228 : vector<2x128xf32>
    %c8_i32_71 = arith.constant 8 : i32
    %230 = arith.muli %arg0, %c8_i32_71 : i32
    %c2_i32_72 = arith.constant 2 : i32
    %231 = arith.addi %230, %c2_i32_72 : i32
    %232 = vector.broadcast %231 : i32 to vector<2x1xi32>
    %233 = arith.cmpi slt, %232, %102 : vector<2x1xi32>
    %234 = arith.extui %233 : vector<2x1xi1> to vector<2x1xi32>
    %235 = arith.sitofp %234 : vector<2x1xi32> to vector<2x1xf32>
    %236 = vector.broadcast %235 : vector<2x1xf32> to vector<2x128xf32>
    %237 = arith.mulf %236, %229 : vector<2x128xf32>
    %cst_73 = arith.constant 1.000000e+00 : f32
    %238 = vector.broadcast %cst_73 : f32 to vector<2x1xf32>
    %239 = arith.subf %238, %235 : vector<2x1xf32>
    %240 = vector.broadcast %239 : vector<2x1xf32> to vector<2x128xf32>
    %241 = arith.mulf %240, %194 : vector<2x128xf32>
    %242 = arith.addf %237, %241 : vector<2x128xf32>
    %243 = vector.broadcast %235 : vector<2x1xf32> to vector<2x128xf32>
    %244 = arith.mulf %229, %243 : vector<2x128xf32>
    %c0_74 = arith.constant 0 : index
    %c2_75 = arith.constant 2 : index
    %c0_76 = arith.constant 0 : index
    %245 = vector.load %arg6[%c0_74, %c2_75, %c0_76] : memref<2x8x128xf32, #tpu.memory_space<vmem>>, vector<2x1x128xf32>
    %246 = vector.shape_cast %245 : vector<2x1x128xf32> to vector<2x128xf32>
    %247 = vector.shape_cast %244 : vector<2x128xf32> to vector<2x1x128xf32>
    tpu.vector_store %arg6[%c0_74, %c2_75, %c0_76], %247 {strides = array<i32>} : memref<2x8x128xf32, #tpu.memory_space<vmem>>, vector<2x1x128xf32>,
    %c6_77 = arith.constant 6 : index
    %c0_78 = arith.constant 0 : index
    %248 = vector.load %arg9[%c6_77, %c0_78] : memref<16x384xf32, #tpu.memory_space<vmem>>, vector<2x384xf32>
    %cst_79 = arith.constant dense<0.000000e+00> : vector<2x384xf32>
    %249 = tpu.matmul %242, %100, %cst_79 {dimension_numbers = #tpu.dot_dimension_numbers<[1], [0], [0], [1], [0, 0, 1, 1], [], []>} : vector<2x128xf32>, vector<128x384xf32>, vector<2x384xf32> -> vector<2x384xf32>
    %250 = vector.broadcast %101 : vector<1x384xf32> to vector<2x384xf32>
    %251 = arith.addf %249, %250 : vector<2x384xf32>
    %252 = vector.extract_strided_slice %248 {offsets = [0, 0], sizes = [2, 128], strides = [1, 1]} : vector<2x384xf32> to vector<2x128xf32>
    %253 = vector.extract_strided_slice %251 {offsets = [0, 0], sizes = [2, 128], strides = [1, 1]} : vector<2x384xf32> to vector<2x128xf32>
    %254 = arith.addf %252, %253 : vector<2x128xf32>
    %255 = arith.negf %254 : vector<2x128xf32>
    %256 = math.exp %255 : vector<2x128xf32>
    %cst_80 = arith.constant 1.000000e+00 : f32
    %257 = vector.broadcast %cst_80 : f32 to vector<2x128xf32>
    %258 = arith.addf %257, %256 : vector<2x128xf32>
    %259 = arith.divf %257, %258 : vector<2x128xf32>
    %260 = vector.extract_strided_slice %248 {offsets = [0, 128], sizes = [2, 128], strides = [1, 1]} : vector<2x384xf32> to vector<2x128xf32>
    %261 = vector.extract_strided_slice %251 {offsets = [0, 128], sizes = [2, 128], strides = [1, 1]} : vector<2x384xf32> to vector<2x128xf32>
    %262 = arith.addf %260, %261 : vector<2x128xf32>
    %263 = arith.negf %262 : vector<2x128xf32>
    %264 = math.exp %263 : vector<2x128xf32>
    %cst_81 = arith.constant 1.000000e+00 : f32
    %265 = vector.broadcast %cst_81 : f32 to vector<2x128xf32>
    %266 = arith.addf %265, %264 : vector<2x128xf32>
    %267 = arith.divf %265, %266 : vector<2x128xf32>
    %268 = vector.extract_strided_slice %248 {offsets = [0, 256], sizes = [2, 128], strides = [1, 1]} : vector<2x384xf32> to vector<2x128xf32>
    %269 = vector.extract_strided_slice %251 {offsets = [0, 256], sizes = [2, 128], strides = [1, 1]} : vector<2x384xf32> to vector<2x128xf32>
    %270 = arith.mulf %259, %269 : vector<2x128xf32>
    %271 = arith.addf %268, %270 : vector<2x128xf32>
    %272 = math.tanh %271 : vector<2x128xf32>
    %cst_82 = arith.constant 1.000000e+00 : f32
    %273 = vector.broadcast %cst_82 : f32 to vector<2x128xf32>
    %274 = arith.subf %273, %267 : vector<2x128xf32>
    %275 = arith.mulf %274, %272 : vector<2x128xf32>
    %276 = arith.mulf %267, %242 : vector<2x128xf32>
    %277 = arith.addf %275, %276 : vector<2x128xf32>
    %c8_i32_83 = arith.constant 8 : i32
    %278 = arith.muli %arg0, %c8_i32_83 : i32
    %c3_i32_84 = arith.constant 3 : i32
    %279 = arith.addi %278, %c3_i32_84 : i32
    %280 = vector.broadcast %279 : i32 to vector<2x1xi32>
    %281 = arith.cmpi slt, %280, %102 : vector<2x1xi32>
    %282 = arith.extui %281 : vector<2x1xi1> to vector<2x1xi32>
    %283 = arith.sitofp %282 : vector<2x1xi32> to vector<2x1xf32>
    %284 = vector.broadcast %283 : vector<2x1xf32> to vector<2x128xf32>
    %285 = arith.mulf %284, %277 : vector<2x128xf32>
    %cst_85 = arith.constant 1.000000e+00 : f32
    %286 = vector.broadcast %cst_85 : f32 to vector<2x1xf32>
    %287 = arith.subf %286, %283 : vector<2x1xf32>
    %288 = vector.broadcast %287 : vector<2x1xf32> to vector<2x128xf32>
    %289 = arith.mulf %288, %242 : vector<2x128xf32>
    %290 = arith.addf %285, %289 : vector<2x128xf32>
    %291 = vector.broadcast %283 : vector<2x1xf32> to vector<2x128xf32>
    %292 = arith.mulf %277, %291 : vector<2x128xf32>
    %c0_86 = arith.constant 0 : index
    %c3_87 = arith.constant 3 : index
    %c0_88 = arith.constant 0 : index
    %293 = vector.load %arg6[%c0_86, %c3_87, %c0_88] : memref<2x8x128xf32, #tpu.memory_space<vmem>>, vector<2x1x128xf32>
    %294 = vector.shape_cast %293 : vector<2x1x128xf32> to vector<2x128xf32>
    %295 = vector.shape_cast %292 : vector<2x128xf32> to vector<2x1x128xf32>
    tpu.vector_store %arg6[%c0_86, %c3_87, %c0_88], %295 {strides = array<i32>} : memref<2x8x128xf32, #tpu.memory_space<vmem>>, vector<2x1x128xf32>,
    %c8_89 = arith.constant 8 : index
    %c0_90 = arith.constant 0 : index
    %296 = vector.load %arg9[%c8_89, %c0_90] : memref<16x384xf32, #tpu.memory_space<vmem>>, vector<2x384xf32>
    %cst_91 = arith.constant dense<0.000000e+00> : vector<2x384xf32>
    %297 = tpu.matmul %290, %100, %cst_91 {dimension_numbers = #tpu.dot_dimension_numbers<[1], [0], [0], [1], [0, 0, 1, 1], [], []>} : vector<2x128xf32>, vector<128x384xf32>, vector<2x384xf32> -> vector<2x384xf32>
    %298 = vector.broadcast %101 : vector<1x384xf32> to vector<2x384xf32>
    %299 = arith.addf %297, %298 : vector<2x384xf32>
    %300 = vector.extract_strided_slice %296 {offsets = [0, 0], sizes = [2, 128], strides = [1, 1]} : vector<2x384xf32> to vector<2x128xf32>
    %301 = vector.extract_strided_slice %299 {offsets = [0, 0], sizes = [2, 128], strides = [1, 1]} : vector<2x384xf32> to vector<2x128xf32>
    %302 = arith.addf %300, %301 : vector<2x128xf32>
    %303 = arith.negf %302 : vector<2x128xf32>
    %304 = math.exp %303 : vector<2x128xf32>
    %cst_92 = arith.constant 1.000000e+00 : f32
    %305 = vector.broadcast %cst_92 : f32 to vector<2x128xf32>
    %306 = arith.addf %305, %304 : vector<2x128xf32>
    %307 = arith.divf %305, %306 : vector<2x128xf32>
    %308 = vector.extract_strided_slice %296 {offsets = [0, 128], sizes = [2, 128], strides = [1, 1]} : vector<2x384xf32> to vector<2x128xf32>
    %309 = vector.extract_strided_slice %299 {offsets = [0, 128], sizes = [2, 128], strides = [1, 1]} : vector<2x384xf32> to vector<2x128xf32>
    %310 = arith.addf %308, %309 : vector<2x128xf32>
    %311 = arith.negf %310 : vector<2x128xf32>
    %312 = math.exp %311 : vector<2x128xf32>
    %cst_93 = arith.constant 1.000000e+00 : f32
    %313 = vector.broadcast %cst_93 : f32 to vector<2x128xf32>
    %314 = arith.addf %313, %312 : vector<2x128xf32>
    %315 = arith.divf %313, %314 : vector<2x128xf32>
    %316 = vector.extract_strided_slice %296 {offsets = [0, 256], sizes = [2, 128], strides = [1, 1]} : vector<2x384xf32> to vector<2x128xf32>
    %317 = vector.extract_strided_slice %299 {offsets = [0, 256], sizes = [2, 128], strides = [1, 1]} : vector<2x384xf32> to vector<2x128xf32>
    %318 = arith.mulf %307, %317 : vector<2x128xf32>
    %319 = arith.addf %316, %318 : vector<2x128xf32>
    %320 = math.tanh %319 : vector<2x128xf32>
    %cst_94 = arith.constant 1.000000e+00 : f32
    %321 = vector.broadcast %cst_94 : f32 to vector<2x128xf32>
    %322 = arith.subf %321, %315 : vector<2x128xf32>
    %323 = arith.mulf %322, %320 : vector<2x128xf32>
    %324 = arith.mulf %315, %290 : vector<2x128xf32>
    %325 = arith.addf %323, %324 : vector<2x128xf32>
    %c8_i32_95 = arith.constant 8 : i32
    %326 = arith.muli %arg0, %c8_i32_95 : i32
    %c4_i32_96 = arith.constant 4 : i32
    %327 = arith.addi %326, %c4_i32_96 : i32
    %328 = vector.broadcast %327 : i32 to vector<2x1xi32>
    %329 = arith.cmpi slt, %328, %102 : vector<2x1xi32>
    %330 = arith.extui %329 : vector<2x1xi1> to vector<2x1xi32>
    %331 = arith.sitofp %330 : vector<2x1xi32> to vector<2x1xf32>
    %332 = vector.broadcast %331 : vector<2x1xf32> to vector<2x128xf32>
    %333 = arith.mulf %332, %325 : vector<2x128xf32>
    %cst_97 = arith.constant 1.000000e+00 : f32
    %334 = vector.broadcast %cst_97 : f32 to vector<2x1xf32>
    %335 = arith.subf %334, %331 : vector<2x1xf32>
    %336 = vector.broadcast %335 : vector<2x1xf32> to vector<2x128xf32>
    %337 = arith.mulf %336, %290 : vector<2x128xf32>
    %338 = arith.addf %333, %337 : vector<2x128xf32>
    %339 = vector.broadcast %331 : vector<2x1xf32> to vector<2x128xf32>
    %340 = arith.mulf %325, %339 : vector<2x128xf32>
    %c0_98 = arith.constant 0 : index
    %c4_99 = arith.constant 4 : index
    %c0_100 = arith.constant 0 : index
    %341 = vector.load %arg6[%c0_98, %c4_99, %c0_100] : memref<2x8x128xf32, #tpu.memory_space<vmem>>, vector<2x1x128xf32>
    %342 = vector.shape_cast %341 : vector<2x1x128xf32> to vector<2x128xf32>
    %343 = vector.shape_cast %340 : vector<2x128xf32> to vector<2x1x128xf32>
    tpu.vector_store %arg6[%c0_98, %c4_99, %c0_100], %343 {strides = array<i32>} : memref<2x8x128xf32, #tpu.memory_space<vmem>>, vector<2x1x128xf32>,
    %c10_101 = arith.constant 10 : index
    %c0_102 = arith.constant 0 : index
    %344 = vector.load %arg9[%c10_101, %c0_102] : memref<16x384xf32, #tpu.memory_space<vmem>>, vector<2x384xf32>
    %cst_103 = arith.constant dense<0.000000e+00> : vector<2x384xf32>
    %345 = tpu.matmul %338, %100, %cst_103 {dimension_numbers = #tpu.dot_dimension_numbers<[1], [0], [0], [1], [0, 0, 1, 1], [], []>} : vector<2x128xf32>, vector<128x384xf32>, vector<2x384xf32> -> vector<2x384xf32>
    %346 = vector.broadcast %101 : vector<1x384xf32> to vector<2x384xf32>
    %347 = arith.addf %345, %346 : vector<2x384xf32>
    %348 = vector.extract_strided_slice %344 {offsets = [0, 0], sizes = [2, 128], strides = [1, 1]} : vector<2x384xf32> to vector<2x128xf32>
    %349 = vector.extract_strided_slice %347 {offsets = [0, 0], sizes = [2, 128], strides = [1, 1]} : vector<2x384xf32> to vector<2x128xf32>
    %350 = arith.addf %348, %349 : vector<2x128xf32>
    %351 = arith.negf %350 : vector<2x128xf32>
    %352 = math.exp %351 : vector<2x128xf32>
    %cst_104 = arith.constant 1.000000e+00 : f32
    %353 = vector.broadcast %cst_104 : f32 to vector<2x128xf32>
    %354 = arith.addf %353, %352 : vector<2x128xf32>
    %355 = arith.divf %353, %354 : vector<2x128xf32>
    %356 = vector.extract_strided_slice %344 {offsets = [0, 128], sizes = [2, 128], strides = [1, 1]} : vector<2x384xf32> to vector<2x128xf32>
    %357 = vector.extract_strided_slice %347 {offsets = [0, 128], sizes = [2, 128], strides = [1, 1]} : vector<2x384xf32> to vector<2x128xf32>
    %358 = arith.addf %356, %357 : vector<2x128xf32>
    %359 = arith.negf %358 : vector<2x128xf32>
    %360 = math.exp %359 : vector<2x128xf32>
    %cst_105 = arith.constant 1.000000e+00 : f32
    %361 = vector.broadcast %cst_105 : f32 to vector<2x128xf32>
    %362 = arith.addf %361, %360 : vector<2x128xf32>
    %363 = arith.divf %361, %362 : vector<2x128xf32>
    %364 = vector.extract_strided_slice %344 {offsets = [0, 256], sizes = [2, 128], strides = [1, 1]} : vector<2x384xf32> to vector<2x128xf32>
    %365 = vector.extract_strided_slice %347 {offsets = [0, 256], sizes = [2, 128], strides = [1, 1]} : vector<2x384xf32> to vector<2x128xf32>
    %366 = arith.mulf %355, %365 : vector<2x128xf32>
    %367 = arith.addf %364, %366 : vector<2x128xf32>
    %368 = math.tanh %367 : vector<2x128xf32>
    %cst_106 = arith.constant 1.000000e+00 : f32
    %369 = vector.broadcast %cst_106 : f32 to vector<2x128xf32>
    %370 = arith.subf %369, %363 : vector<2x128xf32>
    %371 = arith.mulf %370, %368 : vector<2x128xf32>
    %372 = arith.mulf %363, %338 : vector<2x128xf32>
    %373 = arith.addf %371, %372 : vector<2x128xf32>
    %c8_i32_107 = arith.constant 8 : i32
    %374 = arith.muli %arg0, %c8_i32_107 : i32
    %c5_i32_108 = arith.constant 5 : i32
    %375 = arith.addi %374, %c5_i32_108 : i32
    %376 = vector.broadcast %375 : i32 to vector<2x1xi32>
    %377 = arith.cmpi slt, %376, %102 : vector<2x1xi32>
    %378 = arith.extui %377 : vector<2x1xi1> to vector<2x1xi32>
    %379 = arith.sitofp %378 : vector<2x1xi32> to vector<2x1xf32>
    %380 = vector.broadcast %379 : vector<2x1xf32> to vector<2x128xf32>
    %381 = arith.mulf %380, %373 : vector<2x128xf32>
    %cst_109 = arith.constant 1.000000e+00 : f32
    %382 = vector.broadcast %cst_109 : f32 to vector<2x1xf32>
    %383 = arith.subf %382, %379 : vector<2x1xf32>
    %384 = vector.broadcast %383 : vector<2x1xf32> to vector<2x128xf32>
    %385 = arith.mulf %384, %338 : vector<2x128xf32>
    %386 = arith.addf %381, %385 : vector<2x128xf32>
    %387 = vector.broadcast %379 : vector<2x1xf32> to vector<2x128xf32>
    %388 = arith.mulf %373, %387 : vector<2x128xf32>
    %c0_110 = arith.constant 0 : index
    %c5_111 = arith.constant 5 : index
    %c0_112 = arith.constant 0 : index
    %389 = vector.load %arg6[%c0_110, %c5_111, %c0_112] : memref<2x8x128xf32, #tpu.memory_space<vmem>>, vector<2x1x128xf32>
    %390 = vector.shape_cast %389 : vector<2x1x128xf32> to vector<2x128xf32>
    %391 = vector.shape_cast %388 : vector<2x128xf32> to vector<2x1x128xf32>
    tpu.vector_store %arg6[%c0_110, %c5_111, %c0_112], %391 {strides = array<i32>} : memref<2x8x128xf32, #tpu.memory_space<vmem>>, vector<2x1x128xf32>,
    %c12_113 = arith.constant 12 : index
    %c0_114 = arith.constant 0 : index
    %392 = vector.load %arg9[%c12_113, %c0_114] : memref<16x384xf32, #tpu.memory_space<vmem>>, vector<2x384xf32>
    %cst_115 = arith.constant dense<0.000000e+00> : vector<2x384xf32>
    %393 = tpu.matmul %386, %100, %cst_115 {dimension_numbers = #tpu.dot_dimension_numbers<[1], [0], [0], [1], [0, 0, 1, 1], [], []>} : vector<2x128xf32>, vector<128x384xf32>, vector<2x384xf32> -> vector<2x384xf32>
    %394 = vector.broadcast %101 : vector<1x384xf32> to vector<2x384xf32>
    %395 = arith.addf %393, %394 : vector<2x384xf32>
    %396 = vector.extract_strided_slice %392 {offsets = [0, 0], sizes = [2, 128], strides = [1, 1]} : vector<2x384xf32> to vector<2x128xf32>
    %397 = vector.extract_strided_slice %395 {offsets = [0, 0], sizes = [2, 128], strides = [1, 1]} : vector<2x384xf32> to vector<2x128xf32>
    %398 = arith.addf %396, %397 : vector<2x128xf32>
    %399 = arith.negf %398 : vector<2x128xf32>
    %400 = math.exp %399 : vector<2x128xf32>
    %cst_116 = arith.constant 1.000000e+00 : f32
    %401 = vector.broadcast %cst_116 : f32 to vector<2x128xf32>
    %402 = arith.addf %401, %400 : vector<2x128xf32>
    %403 = arith.divf %401, %402 : vector<2x128xf32>
    %404 = vector.extract_strided_slice %392 {offsets = [0, 128], sizes = [2, 128], strides = [1, 1]} : vector<2x384xf32> to vector<2x128xf32>
    %405 = vector.extract_strided_slice %395 {offsets = [0, 128], sizes = [2, 128], strides = [1, 1]} : vector<2x384xf32> to vector<2x128xf32>
    %406 = arith.addf %404, %405 : vector<2x128xf32>
    %407 = arith.negf %406 : vector<2x128xf32>
    %408 = math.exp %407 : vector<2x128xf32>
    %cst_117 = arith.constant 1.000000e+00 : f32
    %409 = vector.broadcast %cst_117 : f32 to vector<2x128xf32>
    %410 = arith.addf %409, %408 : vector<2x128xf32>
    %411 = arith.divf %409, %410 : vector<2x128xf32>
    %412 = vector.extract_strided_slice %392 {offsets = [0, 256], sizes = [2, 128], strides = [1, 1]} : vector<2x384xf32> to vector<2x128xf32>
    %413 = vector.extract_strided_slice %395 {offsets = [0, 256], sizes = [2, 128], strides = [1, 1]} : vector<2x384xf32> to vector<2x128xf32>
    %414 = arith.mulf %403, %413 : vector<2x128xf32>
    %415 = arith.addf %412, %414 : vector<2x128xf32>
    %416 = math.tanh %415 : vector<2x128xf32>
    %cst_118 = arith.constant 1.000000e+00 : f32
    %417 = vector.broadcast %cst_118 : f32 to vector<2x128xf32>
    %418 = arith.subf %417, %411 : vector<2x128xf32>
    %419 = arith.mulf %418, %416 : vector<2x128xf32>
    %420 = arith.mulf %411, %386 : vector<2x128xf32>
    %421 = arith.addf %419, %420 : vector<2x128xf32>
    %c8_i32_119 = arith.constant 8 : i32
    %422 = arith.muli %arg0, %c8_i32_119 : i32
    %c6_i32_120 = arith.constant 6 : i32
    %423 = arith.addi %422, %c6_i32_120 : i32
    %424 = vector.broadcast %423 : i32 to vector<2x1xi32>
    %425 = arith.cmpi slt, %424, %102 : vector<2x1xi32>
    %426 = arith.extui %425 : vector<2x1xi1> to vector<2x1xi32>
    %427 = arith.sitofp %426 : vector<2x1xi32> to vector<2x1xf32>
    %428 = vector.broadcast %427 : vector<2x1xf32> to vector<2x128xf32>
    %429 = arith.mulf %428, %421 : vector<2x128xf32>
    %cst_121 = arith.constant 1.000000e+00 : f32
    %430 = vector.broadcast %cst_121 : f32 to vector<2x1xf32>
    %431 = arith.subf %430, %427 : vector<2x1xf32>
    %432 = vector.broadcast %431 : vector<2x1xf32> to vector<2x128xf32>
    %433 = arith.mulf %432, %386 : vector<2x128xf32>
    %434 = arith.addf %429, %433 : vector<2x128xf32>
    %435 = vector.broadcast %427 : vector<2x1xf32> to vector<2x128xf32>
    %436 = arith.mulf %421, %435 : vector<2x128xf32>
    %c0_122 = arith.constant 0 : index
    %c6_123 = arith.constant 6 : index
    %c0_124 = arith.constant 0 : index
    %437 = vector.load %arg6[%c0_122, %c6_123, %c0_124] : memref<2x8x128xf32, #tpu.memory_space<vmem>>, vector<2x1x128xf32>
    %438 = vector.shape_cast %437 : vector<2x1x128xf32> to vector<2x128xf32>
    %439 = vector.shape_cast %436 : vector<2x128xf32> to vector<2x1x128xf32>
    tpu.vector_store %arg6[%c0_122, %c6_123, %c0_124], %439 {strides = array<i32>} : memref<2x8x128xf32, #tpu.memory_space<vmem>>, vector<2x1x128xf32>,
    %c14_125 = arith.constant 14 : index
    %c0_126 = arith.constant 0 : index
    %440 = vector.load %arg9[%c14_125, %c0_126] : memref<16x384xf32, #tpu.memory_space<vmem>>, vector<2x384xf32>
    %cst_127 = arith.constant dense<0.000000e+00> : vector<2x384xf32>
    %441 = tpu.matmul %434, %100, %cst_127 {dimension_numbers = #tpu.dot_dimension_numbers<[1], [0], [0], [1], [0, 0, 1, 1], [], []>} : vector<2x128xf32>, vector<128x384xf32>, vector<2x384xf32> -> vector<2x384xf32>
    %442 = vector.broadcast %101 : vector<1x384xf32> to vector<2x384xf32>
    %443 = arith.addf %441, %442 : vector<2x384xf32>
    %444 = vector.extract_strided_slice %440 {offsets = [0, 0], sizes = [2, 128], strides = [1, 1]} : vector<2x384xf32> to vector<2x128xf32>
    %445 = vector.extract_strided_slice %443 {offsets = [0, 0], sizes = [2, 128], strides = [1, 1]} : vector<2x384xf32> to vector<2x128xf32>
    %446 = arith.addf %444, %445 : vector<2x128xf32>
    %447 = arith.negf %446 : vector<2x128xf32>
    %448 = math.exp %447 : vector<2x128xf32>
    %cst_128 = arith.constant 1.000000e+00 : f32
    %449 = vector.broadcast %cst_128 : f32 to vector<2x128xf32>
    %450 = arith.addf %449, %448 : vector<2x128xf32>
    %451 = arith.divf %449, %450 : vector<2x128xf32>
    %452 = vector.extract_strided_slice %440 {offsets = [0, 128], sizes = [2, 128], strides = [1, 1]} : vector<2x384xf32> to vector<2x128xf32>
    %453 = vector.extract_strided_slice %443 {offsets = [0, 128], sizes = [2, 128], strides = [1, 1]} : vector<2x384xf32> to vector<2x128xf32>
    %454 = arith.addf %452, %453 : vector<2x128xf32>
    %455 = arith.negf %454 : vector<2x128xf32>
    %456 = math.exp %455 : vector<2x128xf32>
    %cst_129 = arith.constant 1.000000e+00 : f32
    %457 = vector.broadcast %cst_129 : f32 to vector<2x128xf32>
    %458 = arith.addf %457, %456 : vector<2x128xf32>
    %459 = arith.divf %457, %458 : vector<2x128xf32>
    %460 = vector.extract_strided_slice %440 {offsets = [0, 256], sizes = [2, 128], strides = [1, 1]} : vector<2x384xf32> to vector<2x128xf32>
    %461 = vector.extract_strided_slice %443 {offsets = [0, 256], sizes = [2, 128], strides = [1, 1]} : vector<2x384xf32> to vector<2x128xf32>
    %462 = arith.mulf %451, %461 : vector<2x128xf32>
    %463 = arith.addf %460, %462 : vector<2x128xf32>
    %464 = math.tanh %463 : vector<2x128xf32>
    %cst_130 = arith.constant 1.000000e+00 : f32
    %465 = vector.broadcast %cst_130 : f32 to vector<2x128xf32>
    %466 = arith.subf %465, %459 : vector<2x128xf32>
    %467 = arith.mulf %466, %464 : vector<2x128xf32>
    %468 = arith.mulf %459, %434 : vector<2x128xf32>
    %469 = arith.addf %467, %468 : vector<2x128xf32>
    %c8_i32_131 = arith.constant 8 : i32
    %470 = arith.muli %arg0, %c8_i32_131 : i32
    %c7_i32_132 = arith.constant 7 : i32
    %471 = arith.addi %470, %c7_i32_132 : i32
    %472 = vector.broadcast %471 : i32 to vector<2x1xi32>
    %473 = arith.cmpi slt, %472, %102 : vector<2x1xi32>
    %474 = arith.extui %473 : vector<2x1xi1> to vector<2x1xi32>
    %475 = arith.sitofp %474 : vector<2x1xi32> to vector<2x1xf32>
    %476 = vector.broadcast %475 : vector<2x1xf32> to vector<2x128xf32>
    %477 = arith.mulf %476, %469 : vector<2x128xf32>
    %cst_133 = arith.constant 1.000000e+00 : f32
    %478 = vector.broadcast %cst_133 : f32 to vector<2x1xf32>
    %479 = arith.subf %478, %475 : vector<2x1xf32>
    %480 = vector.broadcast %479 : vector<2x1xf32> to vector<2x128xf32>
    %481 = arith.mulf %480, %434 : vector<2x128xf32>
    %482 = arith.addf %477, %481 : vector<2x128xf32>
    %483 = vector.broadcast %475 : vector<2x1xf32> to vector<2x128xf32>
    %484 = arith.mulf %469, %483 : vector<2x128xf32>
    %c0_134 = arith.constant 0 : index
    %c7_135 = arith.constant 7 : index
    %c0_136 = arith.constant 0 : index
    %485 = vector.load %arg6[%c0_134, %c7_135, %c0_136] : memref<2x8x128xf32, #tpu.memory_space<vmem>>, vector<2x1x128xf32>
    %486 = vector.shape_cast %485 : vector<2x1x128xf32> to vector<2x128xf32>
    %487 = vector.shape_cast %484 : vector<2x128xf32> to vector<2x1x128xf32>
    tpu.vector_store %arg6[%c0_134, %c7_135, %c0_136], %487 {strides = array<i32>} : memref<2x8x128xf32, #tpu.memory_space<vmem>>, vector<2x1x128xf32>,
    %c0_137 = arith.constant 0 : index
    %c0_138 = arith.constant 0 : index
    %488 = vector.load %arg8[%c0_137, %c0_138] : memref<2x128xf32, #tpu.memory_space<vmem>>, vector<2x128xf32>
    tpu.vector_store %arg8[%c0_137, %c0_138], %482 {strides = array<i32>} : memref<2x128xf32, #tpu.memory_space<vmem>>, vector<2x128xf32>,
    %c0_i32_139 = arith.constant 0 : i32
    %489 = arith.cmpi eq, %arg0, %c0_i32_139 : i32
    %490 = arith.extui %489 : i1 to i32
    %c0_i32_140 = arith.constant 0 : i32
    %491 = arith.cmpi ne, %490, %c0_i32_140 : i32
    scf.if %491 {
      %c0_141 = arith.constant 0 : index
      %c0_142 = arith.constant 0 : index
      %492 = vector.load %arg7[%c0_141, %c0_142] : memref<2x128xf32, #tpu.memory_space<vmem>>, vector<2x128xf32>
      tpu.vector_store %arg7[%c0_141, %c0_142], %482 {strides = array<i32>} : memref<2x128xf32, #tpu.memory_space<vmem>>, vector<2x128xf32>,
    } else {
    }
    return
  }
  func.func @transform_0(%arg0: i32, %arg1: memref<16xi32, #tpu.memory_space<smem>>) -> (i32, i32) {
    %c0_i32 = arith.constant 0 : i32
    %c0_i32_0 = arith.constant 0 : i32
    %c0_i32_1 = arith.constant 0 : i32
    return %c0_i32, %c0_i32_0 : i32, i32
  }
  func.func @transform_1(%arg0: i32, %arg1: memref<16xi32, #tpu.memory_space<smem>>) -> (i32, i32) {
    %c0_i32 = arith.constant 0 : i32
    %c0_i32_0 = arith.constant 0 : i32
    %c0_i32_1 = arith.constant 0 : i32
    return %c0_i32, %c0_i32_0 : i32, i32
  }
  func.func @transform_2(%arg0: i32, %arg1: memref<16xi32, #tpu.memory_space<smem>>) -> (i32, i32) {
    %c0_i32 = arith.constant 0 : i32
    %c0_i32_0 = arith.constant 0 : i32
    %c0_i32_1 = arith.constant 0 : i32
    return %c0_i32, %c0_i32_0 : i32, i32
  }
  func.func @transform_3(%arg0: i32, %arg1: memref<16xi32, #tpu.memory_space<smem>>) -> (i32, i32) {
    %c0_i32 = arith.constant 0 : i32
    %c0_i32_0 = arith.constant 0 : i32
    %c0_i32_1 = arith.constant 0 : i32
    return %c0_i32, %c0_i32_0 : i32, i32
  }
  func.func @transform_4(%arg0: i32, %arg1: memref<16xi32, #tpu.memory_space<smem>>) -> (i32, i32, i32) {
    %c0_i32 = arith.constant 0 : i32
    %c0_i32_0 = arith.constant 0 : i32
    %c0_i32_1 = arith.constant 0 : i32
    return %c0_i32, %arg0, %c0_i32_0 : i32, i32, i32
  }
  func.func @transform_5(%arg0: i32, %arg1: memref<16xi32, #tpu.memory_space<smem>>) -> (i32, i32) {
    %c0_i32 = arith.constant 0 : i32
    %c0_i32_0 = arith.constant 0 : i32
    %c0_i32_1 = arith.constant 0 : i32
    return %c0_i32, %c0_i32_0 : i32, i32
  }
}

</mosaic_0001>

<bundles_post_ra>
// kernel: tpu_custom_call.1
= control target key start
LH: loop header
LB: loop body
LE: loop exit
PB: predicated region body
PF: predicated region fallthrough
CT: control target
= control target key end

     0   :  { %s3958_s0 = inlined_call_operand.vmem [shape: s32[16], index: 0, kind: input, shape index: {}]   ;;  %s3959_s1 = inlined_call_operand.hbm [shape: f32[64,384], index: 1, kind: input, shape index: {}]   ;;  %s3960_s2 = inlined_call_operand.hbm [shape: f32[128,384], index: 2, kind: input, shape index: {}]   ;;  %s3961_s3 = inlined_call_operand.vmem [shape: f32[1,384], index: 3, kind: input, shape index: {}]   ;;  %s3962_s4 = inlined_call_operand.vmem [shape: s32[2,1], index: 4, kind: input, shape index: {}]   ;;  %s3963_s5 = inlined_call_operand.hbm [shape: f32[2,8,128], index: 5, kind: output, shape index: {0}]   ;;  %s3964_s6 = inlined_call_operand.hbm [shape: f32[2,128], index: 6, kind: output, shape index: {1}]  }
   0x1   :  { %s12_s23 = sshll.u32 %s3958_s0, 4  ;;  %s13_s23 = int_to_ptr.vmem [resolvable:$true] %s12_s23 }
   0x2   :  { %s3257_s24 = scalar_lea.vmem %s13_s23, 16  ;;  %p3262_p1 = scmp.lt.s32.totalorder %s13_s23, %s13_s23 }
   0x3   :  { %p3258_p0 = scmp.ne.s32.totalorder %s13_s23, %s3257_s24  ;;  %p3263_p2 = scmp.lt.s32.totalorder %s3257_s24, %s3257_s24 }
   0x5   :  { %p3264_p3 = por %p3263_p2, %p3262_p1 }
   0x7   :  { %p3265_p4 = pnand %p3264_p3, %p3258_p0 }
   0x9   :  { %3268 = shalt.err (!%p3265_p4)  }
   0xa   :  { %s3367_s25 = smov [#allocation5]  }
   0xb   :  { %15 = dma.vmem_to_smem %s13_s23, 16, %s3367_s25, [#allocation4] }
   0xc   :  { %3357 = dma.done.wait [#allocation4], 16 }
   0xd   :  { %3358 = vsyncadd [#allocation4], 4294967280 }
   0xe   :  { %17 = sfence }
   0xf   :  { %18 = vsyncpa [#allocation7], 0 }
  0x10   :  { %19 = vsyncpa [#allocation10], 0 }
  0x11   :  { %20 = vsyncpa [#allocation8], 0 }
  0x12   :  { %21 = vsyncpa [#allocation13], 0  ;;  %s3368_s26 = smov [#allocation6]   ;;  %s3269_s29 = scalar_lea.hbm %s3959_s1, 3072 }
  0x13   :  { %s27_s27 = sshll.u32 %s3368_s26, 4  ;;  %p3270_p5 = scmp.ne.s32.totalorder %s3959_s1, %s3269_s29  ;;  %s28_s27 = int_to_ptr.vmem [resolvable:$true] %s27_s27 }
  0x14   :  { %p3273_p6 = scmp.lt.u32.totalorder %s3269_s29, %s3959_s1 }
  0x16   :  { %p3275_p7 = pnand %p3273_p6, %p3270_p5 }
  0x18   :  { %3278 = shalt.err (!%p3275_p7)
}
  0x19   :  { %s3279_s10 = scalar_lea.vmem %s28_s27, 3072  ;;  %p3284_p9 = scmp.lt.s32.totalorder %s28_s27, %s28_s27 }
  0x1a   :  { %p3280_p8 = scmp.ne.s32.totalorder %s28_s27, %s3279_s10  ;;  %p3285_p10 = scmp.lt.s32.totalorder %s3279_s10, %s3279_s10 }
  0x1c   :  { %p3286_p11 = por %p3285_p10, %p3284_p9 }
  0x1e   :  { %p3287_p12 = pnand %p3286_p11, %p3280_p8 }
  0x20   :  { %3290 = shalt.err (!%p3287_p12)
}
  0x21   :  { %s3369_s11 = smov 384   ;;  %s3370_s12 = smov 24  }
  0x22   :  { %33 = dma.hbm_to_vmem [thread:$0]  %s3959_s1, 3072, %s28_s27, [#allocation7], %s3369_s11, %s3369_s11, %s3370_s12  }
  0x23   :  { %s3371_s15 = smov [#allocation9]   ;;  %s3291_s19 = scalar_lea.hbm %s3960_s2, 6144 }
  0x24   :  { %s39_s16 = sshll.u32 %s3371_s15, 4  ;;  %p3292_p13 = scmp.ne.s32.totalorder %s3960_s2, %s3291_s19  ;;  %s40_s16 = int_to_ptr.vmem [resolvable:$true] %s39_s16 }
  0x25   :  { %p3295_p0 = scmp.lt.u32.totalorder %s3291_s19, %s3960_s2 }
  0x27   :  { %p3297_p1 = pnand %p3295_p0, %p3292_p13 }
  0x29   :  { %3300 = shalt.err (!%p3297_p1)
}
  0x2a   :  { %s3301_s24 = scalar_lea.vmem %s40_s16, 6144  ;;  %p3306_p3 = scmp.lt.s32.totalorder %s40_s16, %s40_s16 }
  0x2b   :  { %p3302_p2 = scmp.ne.s32.totalorder %s40_s16, %s3301_s24  ;;  %p3307_p4 = scmp.lt.s32.totalorder %s3301_s24, %s3301_s24 }
  0x2d   :  { %p3308_p5 = por %p3307_p4, %p3306_p3 }
  0x2f   :  { %p3309_p6 = pnand %p3308_p5, %p3302_p2 }
  0x31   :  { %3312 = shalt.err (!%p3309_p6)
}
  0x32   :  { %45 = dma.hbm_to_vmem [thread:$0]  %s3960_s2, 6144, %s40_s16, [#allocation10], %s3369_s11, %s3369_s11, %s3370_s12  }
  0x33   :  { %3359 = dma.done.wait [#allocation7], 3072  }
  0x34   :  { %3360 = vsyncadd [#allocation7], 4294964224 }
  0x35   :  { %3361 = dma.done.wait [#allocation10], 6144  }
  0x36   :  { %3362 = vsyncadd [#allocation10], 4294961152  ;;  %v3372_v0 = vmov 0.0|0.0   ;;  %v3373_v1 = vmov 0.0   ;;  %vm3374_vm0 = vmmov 0   ;;  %v3375_v2 = vmov 0  }
  0x37   :  { %2745 = vmatprep.subr.bf16.mxu1 %v3372_v0  ;;  %422 = vmatprep.mubr.f32.mxu0 %v3373_v1  ;;  %60 = vst [vmem:[#allocation2] sm:$0x3] %v3373_v1  ;;  %s3448_s26 = sld [smem:[#allocation5]]  ;;  %s3450_s2 = sld [smem:[#allocation5 + $0x1]]  ;;  %v289_v3 = vld [vmem:[#allocation9 + $0x8] sm:$0xff]  ;;  %v292_v4 = vld [vmem:[#allocation9 + $0x20] sm:$0xff]  ;;  %v72_v30 = vlaneseq }
  0x38   :  { %2465 = vmatprep.mubr.msk.f32.mxu1 %vm3374_vm0, %v3373_v1  ;;  %3175 = vset.pattern.permute.xlu0 %v3375_v2  ;;  %v288_v5 = vld [vmem:[#allocation9] sm:$0xff]  ;;  %v3452_v6 = vpack.c.bf16 %v292_v4, %v289_v3  ;;  %v291_v7 = vld [vmem:[#allocation9 + $0x18] sm:$0xff]  ;;  %v298_v9 = vld [vmem:[#allocation9 + $0x50] sm:$0xff]  ;;  %s2223_s14 = sld [smem:[#allocation5 + $0x3]]  ;;  %s2229_s11 = sld [smem:[#allocation5 + $0x6]] }
  0x39   :  { %3176 = vset.pattern.permute.xlu1 %v3375_v2  ;;  %v295_v8 = vld [vmem:[#allocation9 + $0x38] sm:$0xff]  ;;  %v3454_v10 = vpack.c.bf16 %v291_v7, %v288_v5  ;;  %v294_v12 = vld [vmem:[#allocation9 + $0x30] sm:$0xff]  ;;  %v297_v13 = vld [vmem:[#allocation9 + $0x48] sm:$0xff]  ;;  %vm3490_vm1 = vcmp.lt.s32.totalorder %v72_v30, 384 }
  0x3a   :  { %v3456_v11 = vpack.c.bf16 %v298_v9, %v295_v8  ;;  %v301_v14 = vld [vmem:[#allocation9 + $0x68] sm:$0xff]  ;;  %2714 = vmatprep.subr.bf16.mxu0 %v3452_v6  ;;  %v304_v15 = vld [vmem:[#allocation9 + $0x80] sm:$0xff]  ;;  %v3461_v16 = vpack.c.bf16 %v297_v13, %v294_v12  ;;  %v303_v19 = vld [vmem:[#allocation9 + $0x78] sm:$0xff] }
  0x3b   :  { %2716 = vmatpush1.bf16.msra.mxu0 %v3454_v10  ;;  %v3465_v17 = vpack.c.bf16 %v304_v15, %v301_v14  ;;  %v300_v18 = vld [vmem:[#allocation9 + $0x60] sm:$0xff]  ;;  %v307_v20 = vld [vmem:[#allocation9 + $0x98] sm:$0xff]  ;;  %v310_v21 = vld [vmem:[#allocation9 + $0xb0] sm:$0xff] }
  0x3c   :  { %2718 = vmatprep.subr.bf16.mxu0 %v3456_v11  ;;  %v3469_v22 = vpack.c.bf16 %v303_v19, %v300_v18  ;;  %v3473_v23 = vpack.c.bf16 %v310_v21, %v307_v20  ;;  %v306_v24 = vld [vmem:[#allocation9 + $0x90] sm:$0xff]  ;;  %v309_v25 = vld [vmem:[#allocation9 + $0xa8] sm:$0xff]  ;;  %v316_v27 = vld [vmem:[#allocation9 + $0xe0] sm:$0xff] }
  0x3d   :  { %s63_s27 = sshra.s32 %s3448_s26, 3  ;;  %s80_s0 = sshra.s32 %s3450_s2, 3  ;;  %v313_v26 = vld [vmem:[#allocation9 + $0xc8] sm:$0xff]  ;;  %v290_v28 = vld [vmem:[#allocation9 + $0x10] sm:$0xff]  ;;  %v296_v32 = vld [vmem:[#allocation9 + $0x40] sm:$0xff]  ;;  %v3480_v33 = vpack.c.bf16 %v309_v25, %v306_v24 }
  0x3e   :  { %s2218_s28 = smul.u32 24, %s63_s27  ;;  %s66_s29 = sand.u32 7, %s3448_s26  ;;  %v293_v29 = vld [vmem:[#allocation9 + $0x28] sm:$0xff]  ;;  %v299_v34 = vld [vmem:[#allocation9 + $0x58] sm:$0xff]  ;;  %v3483_v35 = vpack.c.bf16 %v316_v27, %v313_v26  ;;  %v312_v36 = vld [vmem:[#allocation9 + $0xc0] sm:$0xff] }
  0x3f   :  { %s2220_s30 = smul.u32 24, %s80_s0  ;;  %2720 = vmatpush1.bf16.msra.mxu0 %v3461_v16  ;;  %s83_s7 = sand.u32 7, %s3450_s2  ;;  %v3475_v31 = vpack.c.bf16 %v293_v29, %v290_v28  ;;  %v315_v37 = vld [vmem:[#allocation9 + $0xd8] sm:$0xff]  ;;  %v3486_v39 = vpack.c.bf16 %v299_v34, %v296_v32  ;;  %v322_v40 = vld [vmem:[#allocation9 + $0x110] sm:$0xff]  ;;  %v305_v42 = vld [vmem:[#allocation9 + $0x88] sm:$0xff] }
  0x40   :  { %2722 = vmatprep.subr.bf16.mxu0 %v3465_v17  ;;  %s69_s8 = sadd.s32 %s2218_s28, %s66_s29  ;;  %v319_v38 = vld [vmem:[#allocation9 + $0xf8] sm:$0xff]  ;;  %v302_v41 = vld [vmem:[#allocation9 + $0x70] sm:$0xff]  ;;  %v3495_v44 = vpack.c.bf16 %v315_v37, %v312_v36  ;;  %v3500_v46 = vld [vmem:[%s3962_s4] sm:$0x3]  ;;  %s2221_s4 = sld [smem:[#allocation5 + $0x2]] }
  0x41   :  { %s3477_s9 = sadd.s32 %s2220_s30, %s83_s7  ;;  %2747 = vmatpush3.bf16.msra.mxu1 %v3475_v31  ;;  %v318_v45 = vld [vmem:[#allocation9 + $0xf0] sm:$0xff]  ;;  %s70_s12 = scalar_lea.vmem [#allocation6], %s69_s8  ;;  %v3503_v48 = vpack.c.bf16 %v322_v40, %v319_v38  ;;  %v321_v49 = vld [vmem:[#allocation9 + $0x108] sm:$0xff]  ;;  %v3506_v51 = vpack.c.bf16 %v305_v42, %v302_v41  ;;  %vm2251_vm2 = vcmp.gt.s32.totalorder %v3500_v46, 0  ;;  %v328_v53 = vld [vmem:[#allocation9 + $0x140] sm:$0xff]  ;;  %vm2263_vm3 = vcmp.gt.s32.totalorder %v3500_v46, 2 }
  0x42   :  { %2748 = vmatprep.subr.bf16.mxu1 %v3372_v0  ;;  %v71_v47 = vld [vmem:[%s70_s12] ss:$8 sm:$0x7]  ;;  %s87_s13 = scalar_lea.vmem [#allocation6], %s3477_s9  ;;  %v308_v54 = vld [vmem:[#allocation9 + $0xa0] sm:$0xff]  ;;  %v2252_v56 = vsel %vm2251_vm2, 1.0, %v3373_v1  ;;  %v3517_v58 = vpack.c.bf16 %v321_v49, %v318_v45 }
  0x43   :  { %2724 = vmatpush1.bf16.msra.mxu0 %v3469_v22  ;;  %v325_v50 = vld [vmem:[#allocation9 + $0x128] sm:$0xff]  ;;  %76 = vst.msk [vmem:[#allocation3] ss:$8 sm:$0x7] %vm3490_vm1, %v71_v47  ;;  %v311_v55 = vld [vmem:[#allocation9 + $0xb8] sm:$0xff]  ;;  %527 = vperm.xlu0 %3175, %v2252_v56   ;;  %v531_v57 = vsub.f32 1.0, %v2252_v56 }
  0x44   :  { %2726 = vmatprep.subr.bf16.mxu0 %v3473_v23  ;;  %v88_v52 = vld [vmem:[%s87_s13] ss:$8 sm:$0x7]  ;;  %v3520_v59 = vpack.c.bf16 %v328_v53, %v325_v50  ;;  %v324_v60 = vld [vmem:[#allocation9 + $0x120] sm:$0xff]  ;;  %v3523_v63 = vpack.c.bf16 %v311_v55, %v308_v54  ;;  %vm2257_vm4 = vcmp.gt.s32.totalorder %v3500_v46, 1  ;;  %v2264_v9 = vsel %vm2263_vm3, 1.0, %v3373_v1 }
  0x45   :  { %2750 = vmatpush3.bf16.msra.mxu1 %v3486_v39  ;;  %90 = vst.msk [vmem:[#allocation3 + $0x1] ss:$8 sm:$0x7] %vm3490_vm1, %v88_v52  ;;  %v327_v61 = vld [vmem:[#allocation9 + $0x138] sm:$0xff]  ;;  %v334_v2 = vld [vmem:[#allocation9 + $0x170] sm:$0xff]  ;;  %v317_v4 = vld [vmem:[#allocation9 + $0xe8] sm:$0xff] }
  0x46   :  { %2751 = vmatprep.subr.bf16.mxu1 %v3372_v0  ;;  %v331_v62 = vld [vmem:[#allocation9 + $0x158] sm:$0xff]  ;;  %v314_v3 = vld [vmem:[#allocation9 + $0xd0] sm:$0xff]  ;;  %v2258_v5 = vsel %vm2257_vm4, 1.0, %v3373_v1  ;;  %v3530_v8 = vpack.c.bf16 %v327_v61, %v324_v60  ;;  %v333_v14 = vld [vmem:[#allocation9 + $0x168] sm:$0xff]  ;;  %vm2269_vm5 = vcmp.gt.s32.totalorder %v3500_v46, 3  ;;  %v983_v20 = vsub.f32 1.0, %v2264_v9 }
  0x47   :  { %2728 = vmatpush1.bf16.msra.mxu0 %v3480_v33  ;;  %534 = vperm.xlu0 %3175, %v531_v57   ;;  %v757_v7 = vsub.f32 1.0, %v2258_v5  ;;  %v3534_v12 = vpack.c.bf16 %v334_v2, %v331_v62  ;;  %v330_v13 = vld [vmem:[#allocation9 + $0x150] sm:$0xff]  ;;  %v3537_v15 = vpack.c.bf16 %v317_v4, %v314_v3  ;;  %v320_v18 = vld [vmem:[#allocation9 + $0x100] sm:$0xff]  ;;  %v323_v19 = vld [vmem:[#allocation9 + $0x118] sm:$0xff]  ;;  %v2270_v24 = vsel %vm2269_vm5, 1.0, %v3373_v1  ;;  %s94_s15 = sshra.s32 %s2221_s4, 3 }
  0x48   :  { %2730 = vmatprep.subr.bf16.mxu0 %v3483_v35  ;;  %750 = vperm.xlu1 %3176, %v2258_v5   ;;  %v3542_v21 = vpack.c.bf16 %v333_v14, %v330_v13  ;;  %v3547_v25 = vpack.c.bf16 %v323_v19, %v320_v18  ;;  %vm2275_vm6 = vcmp.gt.s32.totalorder %v3500_v46, 4  ;;  %v326_v26 = vld [vmem:[#allocation9 + $0x130] sm:$0xff]  ;;  %v329_v27 = vld [vmem:[#allocation9 + $0x148] sm:$0xff]  ;;  %vm2281_vm7 = vcmp.gt.s32.totalorder %v3500_v46, 5  ;;  %v332_v34 = vld [vmem:[#allocation9 + $0x160] sm:$0xff]  ;;  %s97_s16 = sand.u32 7, %s2221_s4 }
  0x49   :  { %2753 = vmatpush3.bf16.msra.mxu1 %v3506_v51  ;;  %v3552_v28 = vld [vmem:[#allocation2] sm:$0x3]  ;;  %v2276_v29 = vsel %vm2275_vm6, 1.0, %v3373_v1  ;;  %v3556_v32 = vpack.c.bf16 %v329_v27, %v326_v26  ;;  %v335_v36 = vld [vmem:[#allocation9 + $0x178] sm:$0xff]  ;;  %v1209_v37 = vsub.f32 1.0, %v2270_v24  ;;  %v2282_v38 = vsel %vm2281_vm7, 1.0, %v3373_v1 }
  0x4a   :  { %2754 = vmatprep.subr.bf16.mxu1 %v3372_v0  ;;  %v3566_v40 = vpack.c.bf16 %v335_v36, %v332_v34  ;;  %vm2287_vm8 = vcmp.gt.s32.totalorder %v3500_v46, 6  ;;  %v1420_v41 = vsub.f32 1.0, %v2276_v29  ;;  %vm2293_vm9 = vcmp.gt.s32.totalorder %v3500_v46, 7  ;;  %s2222_s17 = smul.u32 24, %s94_s15  ;;  %s108_s18 = sshra.s32 %s2223_s14, 3 }
  0x4b   :  { %2732 = vmatpush1.bf16.msra.mxu0 %v3495_v44  ;;  %976 = vperm.xlu0 %3175, %v2264_v9   ;;  %v2288_v42 = vsel %vm2287_vm8, 1.0, %v3373_v1  ;;  %v1646_v45 = vsub.f32 1.0, %v2282_v38  ;;  %v2294_v47 = vsel %vm2293_vm9, 1.0, %v3373_v1  ;;  %s111_s19 = sand.u32 7, %s2223_s14  ;;  %s2224_s20 = smul.u32 24, %s108_s18  ;;  %v344_v53 = vshrl.u32 %v72_v30, 7 }
  0x4c   :  { %2734 = vmatprep.subr.bf16.mxu0 %v3503_v48  ;;  %760 = vperm.xlu1 %3176, %v757_v7   ;;  %v1872_v46 = vsub.f32 1.0, %v2288_v42  ;;  %v2098_v49 = vsub.f32 1.0, %v2294_v47  ;;  %s100_s21 = sadd.s32 %s2222_s17, %s97_s16  ;;  %v336_v55 = vld [vmem:[%s3961_s3] sm:$0x7]  ;;  %v340_v7 = vld [vmem:[#allocation3 + $0x8] sm:$0x3] }
  0x4d   :  { %2756 = vmatpush3.bf16.msra.mxu1 %v3523_v63  ;;  %s114_s22 = sadd.s32 %s2224_s20, %s111_s19  ;;  %s101_s23 = scalar_lea.vmem [#allocation6], %s100_s21  ;;  %v345_v54 = vsub.s32 0, %v344_v53  ;;  %v349_v56 = vsub.s32 1, %v344_v53  ;;  %v339_v61 = vld [vmem:[#allocation3] sm:$0x3] }
  0x4e   :  { %2757 = vmatprep.subr.bf16.mxu1 %v3372_v0  ;;  %v102_v50 = vld [vmem:[%s101_s23] ss:$8 sm:$0x7]  ;;  %s115_s24 = scalar_lea.vmem [#allocation6], %s114_s22  ;;  %s2225_s3 = sld [smem:[#allocation5 + $0x4]] }
  0x4f   :  { %2736 = vmatpush1.bf16.msra.mxu0 %v3517_v58  ;;  %1202 = vperm.xlu0 %3175, %v2270_v24   ;;  %104 = vst.msk [vmem:[#allocation3 + $0x2] ss:$8 sm:$0x7] %vm3490_vm1, %v102_v50  ;;  %v116_v52 = vld [vmem:[%s115_s24] ss:$8 sm:$0x7]  ;;  %v3617_v57 = vrot.slane %v336_v55, %v345_v54  ;;  %v3619_v60 = vrot.slane %v336_v55, %v349_v56 }
  0x50   :  { %2738 = vmatprep.subr.bf16.mxu0 %v3520_v59  ;;  %986 = vperm.xlu1 %3176, %v983_v20   ;;  %118 = vst.msk [vmem:[#allocation3 + $0x3] ss:$8 sm:$0x7] %vm3490_vm1, %v116_v52  ;;  %v353_v24 = vsub.s32 2, %v344_v53  ;;  %s2227_s26 = sld [smem:[#allocation5 + $0x5]]  ;;  %s2231_s12 = sld [smem:[#allocation5 + $0x7]] }
  0x51   :  { %2759 = vmatpush3.bf16.msra.mxu1 %v3537_v15  ;;  %s150_s13 = sshra.s32 %s2229_s11, 3  ;;  %s153_s4 = sand.u32 7, %s2229_s11 }
  0x52   :  { %2760 = vmatprep.subr.bf16.mxu1 %v3372_v0  ;;  %v3623_v26 = vrot.slane %v336_v55, %v353_v24  ;;  %s2230_s14 = smul.u32 24, %s150_s13  ;;  %s2233_s22 = sld [smem:[#allocation5 + $0x8]] }
  0x53   :  { %2740 = vmatpush1.bf16.msra.mxu0 %v3530_v8  ;;  %1416 = vperm.xlu0 %3175, %v2276_v29   ;;  %s2235_s23 = sld [smem:[#allocation5 + $0x9]] }
  0x54   :  { %2742 = vmatprep.subr.bf16.mxu0 %v3534_v12  ;;  %1212 = vperm.xlu1 %3176, %v1209_v37   ;;  %v341_v37 = vld [vmem:[#allocation3 + $0x10] sm:$0x3]  ;;  %s122_s2 = sshra.s32 %s2225_s3, 3  ;;  %s125_s27 = sand.u32 7, %s2225_s3 }
  0x55   :  { %2762 = vmatpush3.bf16.msra.mxu1 %v3547_v25  ;;  %s2226_s0 = smul.u32 24, %s122_s2  ;;  %s156_s18 = sadd.s32 %s2230_s14, %s153_s4 }
  0x56   :  { %2763 = vmatprep.subr.bf16.mxu1 %v3372_v0  ;;  %s136_s28 = sshra.s32 %s2227_s26, 3  ;;  %s139_s29 = sand.u32 7, %s2227_s26 }
  0x57   :  { %2744 = vmatpush1.bf16.msra.mxu0 %v3542_v21  ;;  %1639 = vperm.xlu0 %3175, %v2282_v38   ;;  %s2228_s30 = smul.u32 24, %s136_s28  ;;  %s128_s7 = sadd.s32 %s2226_s0, %s125_s27 }
  0x58   :  { %2770 = vmatprep.subr.bf16.mxu0 %v3452_v6  ;;  %1423 = vperm.xlu1 %3176, %v1420_v41   ;;  %s129_s9 = scalar_lea.vmem [#allocation6], %s128_s7  ;;  %s164_s15 = sshra.s32 %s2231_s12, 3 }
  0x59   :  { %2765 = vmatpush3.bf16.msra.mxu1 %v3556_v32  ;;  %s142_s8 = sadd.s32 %s2228_s30, %s139_s29  ;;  %s167_s16 = sand.u32 7, %s2231_s12 }
  0x5a   :  { %423 = vmatmul.mubr.f32.vlgmr.msra.gmra.mrb[0].mxu0 %v3552_v28  ;;  %2766 = vmatprep.subr.bf16.mxu1 %v3372_v0  ;;  %s143_s10 = scalar_lea.vmem [#allocation6], %s142_s8  ;;  %s2232_s17 = smul.u32 24, %s164_s15 }
  0x5b   :  { %2772 = vmatpush1.bf16.msra.mxu0 %v3454_v10  ;;  %633 = vmatprep.mubr.f32.mxu0 %v3373_v1  ;;  %s157_s20 = scalar_lea.vmem [#allocation6], %s156_s18  ;;  %s178_s24 = sshra.s32 %s2233_s22, 3 }
  0x5c   :  { %2774 = vmatprep.subr.bf16.mxu0 %v3456_v11  ;;  %1865 = vperm.xlu0 %3175, %v2288_v42   ;;  %v3376_v42 = vmov 1966171168   ;;  %s170_s19 = sadd.s32 %s2232_s17, %s167_s16  ;;  %s181_s1 = sand.u32 7, %s2233_s22 }
  0x5d   :  { %2768 = vmatpush3.bf16.msra.mxu1 %v3566_v40  ;;  %1649 = vperm.xlu1 %3176, %v1646_v45   ;;  %v541_v45 = vunpack.c.l.s4 %v3376_v42  ;;  %s171_s21 = scalar_lea.vmem [#allocation6], %s170_s19  ;;  %s2234_s25 = smul.u32 24, %s178_s24 }
  0x5e   :  { %2801 = vmatprep.subr.bf16.mxu1 %v3372_v0  ;;  %s192_s3 = sshra.s32 %s2235_s23, 3  ;;  %s195_s26 = sand.u32 7, %s2235_s23 }
  0x5f   :  { %2776 = vmatpush1.bf16.msra.mxu0 %v3461_v16  ;;  %s2236_s2 = smul.u32 24, %s192_s3  ;;  %s184_s27 = sadd.s32 %s2234_s25, %s181_s1 }
  0x60   :  { %2778 = vmatprep.subr.bf16.mxu0 %v3465_v17  ;;  %2466 = vmatmul.mubr.f32.vlgmr.msra.gmra.mrb[0].mxu1 %v3552_v28  ;;  %s185_s28 = scalar_lea.vmem [#allocation6], %s184_s27  ;;  %s2237_s30 = sld [smem:[#allocation5 + $0xa]] }
  0x61   :  { %2803 = vmatpush3.bf16.msra.mxu1 %v3475_v31  ;;  %2500 = vmatprep.mubr.msk.f32.mxu1 %vm3374_vm0, %v3373_v1  ;;  %s198_s0 = sadd.s32 %s2236_s2, %s195_s26  ;;  %s2239_s7 = sld [smem:[#allocation5 + $0xb]] }
  0x62   :  { %2804 = vmatprep.subr.bf16.mxu1 %v3372_v0  ;;  %2091 = vperm.xlu0 %3175, %v2294_v47   ;;  %s199_s29 = scalar_lea.vmem [#allocation6], %s198_s0  ;;  %s2241_s17 = sld [smem:[#allocation5 + $0xc]] }
  0x63   :  { %2780 = vmatpush1.bf16.msra.mxu0 %v3469_v22  ;;  %1875 = vperm.xlu1 %3176, %v1872_v46   ;;  %s2243_s18 = sld [smem:[#allocation5 + $0xd]]  ;;  %s2245_s2 = sld [smem:[#allocation5 + $0xe]] }
  0x64   :  { %2782 = vmatprep.subr.bf16.mxu0 %v3473_v23  ;;  %s2247_s27 = sld [smem:[#allocation5 + $0xf]] }
  0x65   :  { %2806 = vmatpush3.bf16.msra.mxu1 %v3486_v39 }
  0x66   :  { %2807 = vmatprep.subr.bf16.mxu1 %v3372_v0  ;;  %s206_s8 = sshra.s32 %s2237_s30, 3 }
  0x67   :  { %2784 = vmatpush1.bf16.msra.mxu0 %v3480_v33  ;;  %2101 = vperm.xlu1 %3176, %v2098_v49   ;;  %v542_v49 = vunpack.c.0.s8 %v541_v45  ;;  %s220_s11 = sshra.s32 %s2239_s7, 3  ;;  %s223_s12 = sand.u32 7, %s2239_s7 }
  0x68   :  { %2786 = vmatprep.subr.bf16.mxu0 %v3483_v35  ;;  %s2240_s13 = smul.u32 24, %s220_s11  ;;  %s234_s19 = sshra.s32 %s2241_s17, 3 }
  0x69   :  { %2809 = vmatpush3.bf16.msra.mxu1 %v3506_v51  ;;  %v3627_v56 = vsub.s32 %v542_v49, %v344_v53  ;;  %v144_v53 = vld [vmem:[%s143_s10] ss:$8 sm:$0x7]  ;;  %s2238_s10 = smul.u32 24, %s206_s8  ;;  %s248_s22 = sshra.s32 %s2243_s18, 3 }
  0x6a   :  { %2810 = vmatprep.subr.bf16.mxu1 %v3372_v0  ;;  %146 = vst.msk [vmem:[#allocation3 + $0x5] ss:$8 sm:$0x7] %vm3490_vm1, %v144_v53  ;;  %s226_s14 = sadd.s32 %s2240_s13, %s223_s12  ;;  %s251_s23 = sand.u32 7, %s2243_s18 }
  0x6b   :  { %2788 = vmatpush1.bf16.msra.mxu0 %v3495_v44  ;;  %s227_s16 = scalar_lea.vmem [#allocation6], %s226_s14  ;;  %s2244_s24 = smul.u32 24, %s248_s22 }
  0x6c   :  { %2790 = vmatprep.subr.bf16.mxu0 %v3503_v48  ;;  %s262_s0 = sshra.s32 %s2245_s2, 3  ;;  %s279_s7 = sand.u32 7, %s2247_s27 }
  0x6d   :  { %2812 = vmatpush3.bf16.msra.mxu1 %v3523_v63  ;;  %s254_s25 = sadd.s32 %s2244_s24, %s251_s23  ;;  %s3377_s13 = smov [#allocation12]  }
  0x6e   :  { %2813 = vmatprep.subr.bf16.mxu1 %v3372_v0  ;;  %s255_s26 = scalar_lea.vmem [#allocation6], %s254_s25  ;;  %s3378_s14 = smov [#allocation11]  }
  0x6f   :  { %2792 = vmatpush1.bf16.msra.mxu0 %v3517_v58 }
  0x70   :  { %2794 = vmatprep.subr.bf16.mxu0 %v3520_v59 }
  0x71   :  { %2815 = vmatpush3.bf16.msra.mxu1 %v3537_v15 }
  0x72   :  { %2816 = vmatprep.subr.bf16.mxu1 %v3372_v0 }
  0x73   :  { %2796 = vmatpush1.bf16.msra.mxu0 %v3530_v8 }
  0x74   :  { %2798 = vmatprep.subr.bf16.mxu0 %v3534_v12 }
  0x75   :  { %2818 = vmatpush3.bf16.msra.mxu1 %v3547_v25 }
  0x76   :  { %2819 = vmatprep.subr.bf16.mxu1 %v3372_v0 }
  0x77   :  { %2800 = vmatpush1.bf16.msra.mxu0 %v3542_v21 }
  0x78   :  { %2826 = vmatprep.subr.bf16.mxu0 %v3452_v6 }
  0x79   :  { %2821 = vmatpush3.bf16.msra.mxu1 %v3556_v32 }
  0x7a   :  { %2822 = vmatprep.subr.bf16.mxu1 %v3372_v0 }
  0x7d   :  { %2824 = vmatpush3.bf16.msra.mxu1 %v3566_v40 }
  0x7e   :  { %2857 = vmatprep.subr.bf16.mxu1 %v3372_v0 }
  0xc2   :  { %v528_v46 = vpop.permute.xlu0 %527 }
 0x12d   :  { %v424_v62 = vpop.f32.mrb[0].mxu0 }
 0x12e   :  { %v425_v2 = vadd.f32 %v424_v62, %v3617_v57  ;;  %v426_v3 = vpop.f32.mrb[1].mxu0  ;;  %v535_v62 = vpop.permute.xlu0 %534 }
 0x12f   :  { %v427_v4 = vadd.f32 %v426_v3, %v3619_v60 }
 0x130   :  { %v499_v5 = vadd.f32 %v425_v2, %v339_v61  ;;  %v537_v2 = vmul.f32 %v535_v62, %v3552_v28 }
 0x131   :  { %v506_v9 = vadd.f32 %v427_v4, %v340_v7 }
 0x132   :  { %v2249_v30 = vmul.f32 -1.442695, %v499_v5 }
 0x133   :  { %v495_v13 = vpop.f32.mrb[0].mxu1  ;;  %v2250_v14 = vmul.f32 -1.442695, %v506_v9 }
 0x134   :  { %3177 = vpow2.f32 %v2249_v30  ;;  %v2467_v18 = vpop.f32.mrb[1].mxu1  ;;  %v496_v34 = vadd.f32 %v495_v13, %v3623_v26 }
 0x135   :  { %3179 = vpow2.f32 %v2250_v14 }
 0x13e   :  { %v3178_v19 = vpop.eup %3177 }
 0x13f   :  { %v503_v20 = vadd.f32 1.0, %v3178_v19  ;;  %v3180_v27 = vpop.eup %3179  ;;  %v566_v19 = vld [vmem:[#allocation3] sm:$0xc] }
 0x140   :  { %v510_v29 = vadd.f32 1.0, %v3180_v27  ;;  %v567_v27 = vld [vmem:[#allocation3 + $0x8] sm:$0xc] }
 0x141   :  { %3181 = vrcp.f32 %v503_v20 }
 0x142   :  { %3183 = vrcp.f32 %v510_v29 }
 0x14b   :  { %v3182_v36 = vpop.eup %3181 }
 0x14c   :  { %v513_v38 = vmul.f32 %v3182_v36, %v496_v34  ;;  %v3184_v47 = vpop.eup %3183 }
 0x14d   :  { %v516_v50 = vsub.f32 1.0, %v3184_v47  ;;  %v518_v55 = vmul.f32 %v3184_v47, %v3552_v28  ;;  %v130_v28 = vld [vmem:[%s129_s9] ss:$8 sm:$0x7]  ;;  %s209_s9 = sand.u32 7, %s2237_s30  ;;  %s276_s30 = sshra.s32 %s2247_s27, 3 }
 0x14e   :  { %v514_v41 = vadd.f32 %v513_v38, %v341_v37  ;;  %132 = vst.msk [vmem:[#allocation3 + $0x4] ss:$8 sm:$0x7] %vm3490_vm1, %v130_v28  ;;  %s212_s4 = sadd.s32 %s2238_s10, %s209_s9  ;;  %s2248_s8 = smul.u32 24, %s276_s30 }
 0x14f   :  { %s213_s15 = scalar_lea.vmem [#allocation6], %s212_s4  ;;  %s2156_s4 = sshll.u32 %s3377_s13, 4  ;;  %s2157_s4 = int_to_ptr.vmem [resolvable:$true] %s2156_s4 }
 0x150   :  { %3185 = vtanh.f32 %v514_v41  ;;  %s282_s10 = sadd.s32 %s2248_s8, %s279_s7  ;;  %p3318_p8 = scmp.lt.s32.totalorder %s2157_s4, %s2157_s4 }
 0x151   :  { %s283_s12 = scalar_lea.vmem [#allocation6], %s282_s10 }
 0x15a   :  { %v3186_v52 = vpop.eup %3185 }
 0x15b   :  { %v517_v54 = vmul.f32 %v3186_v52, %v516_v50 }
 0x15d   :  { %v519_v61 = vadd.f32 %v518_v55, %v517_v54  ;;  %v568_v54 = vld [vmem:[#allocation3 + $0x10] sm:$0xc] }
 0x15f   :  { %v530_v3 = vmul.f32 %v528_v46, %v519_v61 }
 0x161   :  { %v3630_v4 = vadd.f32 %v537_v2, %v530_v3  ;;  %v546_v5 = vrot.slane %v530_v3, %v3627_v56  ;;  %v751_v3 = vpop.permute.xlu1 %750 }
 0x163   :  { %v547_v7 = vcombine.high %v546_v5, %v546_v5  ;;  %2253 = vst.sshfl [vmem:[#allocation11] sm:$0x1 pattern:$0x73625140] %v546_v5  ;;  %634 = vmatmul.mubr.f32.vlgmr.msra.gmra.mrb[2].mxu0 %v3630_v4  ;;  %2501 = vmatmul.mubr.f32.vlgmr.msra.gmra.mrb[2].mxu1 %v3630_v4  ;;  %v739_v52 = vrot.slane %v3630_v4, 6 }
 0x164   :  { %2828 = vmatpush1.bf16.msra.mxu0 %v3454_v10  ;;  %2859 = vmatpush3.bf16.msra.mxu1 %v3475_v31 }
 0x165   :  { %2254 = vst.sshfl [vmem:[#allocation11 + $0x8] sm:$0x1 pattern:$0x73625140] %v547_v7  ;;  %2830 = vmatprep.subr.bf16.mxu0 %v3456_v11  ;;  %2860 = vmatprep.subr.bf16.mxu1 %v3372_v0 }
 0x166   :  { %859 = vmatprep.mubr.f32.mxu0 %v3373_v1  ;;  %2535 = vmatprep.mubr.msk.f32.mxu1 %vm3374_vm0, %v3373_v1 }
 0x168   :  { %2832 = vmatpush1.bf16.msra.mxu0 %v3461_v16  ;;  %2862 = vmatpush3.bf16.msra.mxu1 %v3486_v39 }
 0x169   :  { %2834 = vmatprep.subr.bf16.mxu0 %v3465_v17  ;;  %2863 = vmatprep.subr.bf16.mxu1 %v3372_v0 }
 0x16c   :  { %2836 = vmatpush1.bf16.msra.mxu0 %v3469_v22  ;;  %2865 = vmatpush3.bf16.msra.mxu1 %v3506_v51 }
 0x16d   :  { %2838 = vmatprep.subr.bf16.mxu0 %v3473_v23  ;;  %2866 = vmatprep.subr.bf16.mxu1 %v3372_v0 }
 0x170   :  { %2840 = vmatpush1.bf16.msra.mxu0 %v3480_v33  ;;  %2868 = vmatpush3.bf16.msra.mxu1 %v3523_v63 }
 0x171   :  { %2842 = vmatprep.subr.bf16.mxu0 %v3483_v35  ;;  %2869 = vmatprep.subr.bf16.mxu1 %v3372_v0 }
 0x174   :  { %2844 = vmatpush1.bf16.msra.mxu0 %v3495_v44  ;;  %2871 = vmatpush3.bf16.msra.mxu1 %v3537_v15 }
 0x175   :  { %2846 = vmatprep.subr.bf16.mxu0 %v3503_v48  ;;  %2872 = vmatprep.subr.bf16.mxu1 %v3372_v0 }
 0x178   :  { %2848 = vmatpush1.bf16.msra.mxu0 %v3517_v58  ;;  %2874 = vmatpush3.bf16.msra.mxu1 %v3547_v25 }
 0x179   :  { %2850 = vmatprep.subr.bf16.mxu0 %v3520_v59  ;;  %2875 = vmatprep.subr.bf16.mxu1 %v3372_v0 }
 0x17c   :  { %2852 = vmatpush1.bf16.msra.mxu0 %v3530_v8  ;;  %2877 = vmatpush3.bf16.msra.mxu1 %v3556_v32 }
 0x17d   :  { %2854 = vmatprep.subr.bf16.mxu0 %v3534_v12  ;;  %2878 = vmatprep.subr.bf16.mxu1 %v3372_v0 }
 0x180   :  { %2856 = vmatpush1.bf16.msra.mxu0 %v3542_v21  ;;  %2880 = vmatpush3.bf16.msra.mxu1 %v3566_v40 }
 0x181   :  { %2882 = vmatprep.subr.bf16.mxu0 %v3452_v6  ;;  %2913 = vmatprep.subr.bf16.mxu1 %v3372_v0 }
 0x236   :  { %v635_v30 = vpop.f32.mrb[2].mxu0  ;;  %v706_v9 = vpop.f32.mrb[2].mxu1 }
 0x237   :  { %v636_v13 = vadd.f32 %v635_v30, %v3617_v57  ;;  %v637_v14 = vpop.f32.mrb[3].mxu0  ;;  %v2502_v18 = vpop.f32.mrb[3].mxu1  ;;  %v707_v46 = vadd.f32 %v706_v9, %v3623_v26 }
 0x238   :  { %v638_v20 = vadd.f32 %v637_v14, %v3619_v60  ;;  %v761_v30 = vpop.permute.xlu1 %760 }
 0x239   :  { %v711_v24 = vrot.slane %v636_v13, 6  ;;  %v731_v49 = vrot.slane %v707_v46, 6  ;;  %v763_v14 = vmul.f32 %v761_v30, %v3630_v4  ;;  %v158_v4 = vld [vmem:[%s157_s20] ss:$8 sm:$0x7]  ;;  %s237_s20 = sand.u32 7, %s2241_s17 }
 0x23a   :  { %v721_v29 = vrot.slane %v638_v20, 6  ;;  %160 = vst.msk [vmem:[#allocation3 + $0x6] ss:$8 sm:$0x7] %vm3490_vm1, %v158_v4 }
 0x23b   :  { %v713_v34 = vadd.f32 %v711_v24, %v566_v19  ;;  %v172_v24 = vld [vmem:[%s171_s21] ss:$8 sm:$0x7]  ;;  %s2242_s21 = smul.u32 24, %s234_s19 }
 0x23c   :  { %v723_v36 = vadd.f32 %v721_v29, %v567_v27  ;;  %174 = vst.msk [vmem:[#allocation3 + $0x7] ss:$8 sm:$0x7] %vm3490_vm1, %v172_v24 }
 0x23d   :  { %v2255_v37 = vmul.f32 -1.442695, %v713_v34  ;;  %s240_s1 = sadd.s32 %s2242_s21, %s237_s20 }
 0x23e   :  { %v2256_v38 = vmul.f32 -1.442695, %v723_v36  ;;  %s241_s3 = scalar_lea.vmem [#allocation6], %s240_s1 }
 0x23f   :  { %3187 = vpow2.f32 %v2255_v37 }
 0x240   :  { %3189 = vpow2.f32 %v2256_v38  ;;  %v792_v38 = vld [vmem:[#allocation3] sm:$0x30] }
 0x249   :  { %v3188_v41 = vpop.eup %3187 }
 0x24a   :  { %v3190_v42 = vpop.eup %3189  ;;  %v717_v45 = vadd.f32 1.0, %v3188_v41 }
 0x24b   :  { %v727_v47 = vadd.f32 1.0, %v3190_v42 }
 0x24c   :  { %3191 = vrcp.f32 %v717_v45  ;;  %v793_v45 = vld [vmem:[#allocation3 + $0x8] sm:$0x30] }
 0x24d   :  { %3193 = vrcp.f32 %v727_v47 }
 0x256   :  { %v3192_v50 = vpop.eup %3191 }
 0x257   :  { %v3194_v55 = vpop.eup %3193  ;;  %v733_v61 = vmul.f32 %v3192_v50, %v731_v49 }
 0x258   :  { %v741_v62 = vmul.f32 %v3194_v55, %v739_v52  ;;  %v736_v5 = vsub.f32 1.0, %v3194_v55 }
 0x259   :  { %v734_v2 = vadd.f32 %v733_v61, %v568_v54 }
 0x25b   :  { %3195 = vtanh.f32 %v734_v2 }
 0x265   :  { %v3196_v7 = vpop.eup %3195 }
 0x266   :  { %v737_v28 = vmul.f32 %v3196_v7, %v736_v5  ;;  %v794_v7 = vld [vmem:[#allocation3 + $0x10] sm:$0x30] }
 0x268   :  { %v742_v53 = vadd.f32 %v741_v62, %v737_v28 }
 0x26a   :  { %v754_v13 = vrot.slane %v742_v53, 2 }
 0x26c   :  { %v756_v9 = vmul.f32 %v754_v13, %v751_v3 }
 0x26e   :  { %v3679_v18 = vadd.f32 %v763_v14, %v756_v9  ;;  %v772_v19 = vrot.slane %v756_v9, %v3627_v56 }
 0x270   :  { %v773_v20 = vcombine.high %v772_v19, %v772_v19  ;;  %2259 = vst.sshfl [vmem:[#allocation11 + $0x1] sm:$0x1 pattern:$0x73625140] %v772_v19  ;;  %860 = vmatmul.mubr.f32.vlgmr.msra.gmra.mrb[4].mxu0 %v3679_v18  ;;  %2536 = vmatmul.mubr.f32.vlgmr.msra.gmra.mrb[4].mxu1 %v3679_v18  ;;  %v965_v28 = vrot.slane %v3679_v18, 4 }
 0x271   :  { %2884 = vmatpush1.bf16.msra.mxu0 %v3454_v10  ;;  %2915 = vmatpush3.bf16.msra.mxu1 %v3475_v31 }
 0x272   :  { %2260 = vst.sshfl [vmem:[#allocation11 + $0x9] sm:$0x1 pattern:$0x73625140] %v773_v20  ;;  %2886 = vmatprep.subr.bf16.mxu0 %v3456_v11  ;;  %2916 = vmatprep.subr.bf16.mxu1 %v3372_v0 }
 0x273   :  { %1085 = vmatprep.mubr.f32.mxu0 %v3373_v1  ;;  %2570 = vmatprep.mubr.msk.f32.mxu1 %vm3374_vm0, %v3373_v1 }
 0x275   :  { %2888 = vmatpush1.bf16.msra.mxu0 %v3461_v16  ;;  %2918 = vmatpush3.bf16.msra.mxu1 %v3486_v39 }
 0x276   :  { %2890 = vmatprep.subr.bf16.mxu0 %v3465_v17  ;;  %2919 = vmatprep.subr.bf16.mxu1 %v3372_v0 }
 0x279   :  { %2892 = vmatpush1.bf16.msra.mxu0 %v3469_v22  ;;  %2921 = vmatpush3.bf16.msra.mxu1 %v3506_v51 }
 0x27a   :  { %2894 = vmatprep.subr.bf16.mxu0 %v3473_v23  ;;  %2922 = vmatprep.subr.bf16.mxu1 %v3372_v0 }
 0x27d   :  { %2896 = vmatpush1.bf16.msra.mxu0 %v3480_v33  ;;  %2924 = vmatpush3.bf16.msra.mxu1 %v3523_v63 }
 0x27e   :  { %2898 = vmatprep.subr.bf16.mxu0 %v3483_v35  ;;  %2925 = vmatprep.subr.bf16.mxu1 %v3372_v0 }
 0x281   :  { %2900 = vmatpush1.bf16.msra.mxu0 %v3495_v44  ;;  %2927 = vmatpush3.bf16.msra.mxu1 %v3537_v15 }
 0x282   :  { %2902 = vmatprep.subr.bf16.mxu0 %v3503_v48  ;;  %2928 = vmatprep.subr.bf16.mxu1 %v3372_v0 }
 0x285   :  { %2904 = vmatpush1.bf16.msra.mxu0 %v3517_v58  ;;  %2930 = vmatpush3.bf16.msra.mxu1 %v3547_v25 }
 0x286   :  { %2906 = vmatprep.subr.bf16.mxu0 %v3520_v59  ;;  %2931 = vmatprep.subr.bf16.mxu1 %v3372_v0 }
 0x289   :  { %2908 = vmatpush1.bf16.msra.mxu0 %v3530_v8  ;;  %2933 = vmatpush3.bf16.msra.mxu1 %v3556_v32 }
 0x28a   :  { %2910 = vmatprep.subr.bf16.mxu0 %v3534_v12  ;;  %2934 = vmatprep.subr.bf16.mxu1 %v3372_v0 }
 0x28d   :  { %2912 = vmatpush1.bf16.msra.mxu0 %v3542_v21  ;;  %2936 = vmatpush3.bf16.msra.mxu1 %v3566_v40 }
 0x28e   :  { %2938 = vmatprep.subr.bf16.mxu0 %v3452_v6  ;;  %2969 = vmatprep.subr.bf16.mxu1 %v3372_v0 }
 0x343   :  { %v861_v27 = vpop.f32.mrb[4].mxu0  ;;  %v932_v29 = vpop.f32.mrb[4].mxu1 }
 0x344   :  { %v862_v34 = vadd.f32 %v861_v27, %v3617_v57  ;;  %v863_v36 = vpop.f32.mrb[5].mxu0  ;;  %v2537_v37 = vpop.f32.mrb[5].mxu1  ;;  %v933_v2 = vadd.f32 %v932_v29, %v3623_v26 }
 0x345   :  { %v864_v41 = vadd.f32 %v863_v36, %v3619_v60  ;;  %v977_v27 = vpop.permute.xlu0 %976 }
 0x346   :  { %v937_v42 = vrot.slane %v862_v34, 4  ;;  %v957_v3 = vrot.slane %v933_v2, 4  ;;  %v987_v34 = vpop.permute.xlu1 %986 }
 0x347   :  { %v947_v47 = vrot.slane %v864_v41, 4  ;;  %v989_v36 = vmul.f32 %v987_v34, %v3679_v18  ;;  %v186_v18 = vld [vmem:[%s185_s28] ss:$8 sm:$0x7]  ;;  %s265_s28 = sand.u32 7, %s2245_s2 }
 0x348   :  { %v939_v46 = vadd.f32 %v937_v42, %v792_v38  ;;  %188 = vst.msk [vmem:[#allocation3 + $0x18] ss:$8 sm:$0x7] %vm3490_vm1, %v186_v18  ;;  %v200_v42 = vld [vmem:[%s199_s29] ss:$8 sm:$0x7] }
 0x349   :  { %v949_v49 = vadd.f32 %v947_v47, %v793_v45  ;;  %202 = vst.msk [vmem:[#allocation3 + $0x19] ss:$8 sm:$0x7] %vm3490_vm1, %v200_v42  ;;  %s2246_s29 = smul.u32 24, %s262_s0 }
 0x34a   :  { %v2261_v50 = vmul.f32 -1.442695, %v939_v46 }
 0x34b   :  { %v2262_v52 = vmul.f32 -1.442695, %v949_v49  ;;  %s268_s9 = sadd.s32 %s2246_s29, %s265_s28 }
 0x34c   :  { %3197 = vpow2.f32 %v2261_v50  ;;  %s269_s11 = scalar_lea.vmem [#allocation6], %s268_s9 }
 0x34d   :  { %3199 = vpow2.f32 %v2262_v52  ;;  %v1018_v52 = vld [vmem:[#allocation3] sm:$0xc0] }
 0x356   :  { %v3198_v54 = vpop.eup %3197 }
 0x357   :  { %v3200_v55 = vpop.eup %3199  ;;  %v943_v61 = vadd.f32 1.0, %v3198_v54 }
 0x358   :  { %v953_v62 = vadd.f32 1.0, %v3200_v55 }
 0x359   :  { %3201 = vrcp.f32 %v943_v61  ;;  %v1019_v61 = vld [vmem:[#allocation3 + $0x8] sm:$0xc0] }
 0x35a   :  { %3203 = vrcp.f32 %v953_v62 }
 0x363   :  { %v3202_v5 = vpop.eup %3201 }
 0x364   :  { %v3204_v53 = vpop.eup %3203  ;;  %v959_v30 = vmul.f32 %v3202_v5, %v957_v3 }
 0x365   :  { %v967_v13 = vmul.f32 %v3204_v53, %v965_v28  ;;  %v962_v9 = vsub.f32 1.0, %v3204_v53 }
 0x366   :  { %v960_v14 = vadd.f32 %v959_v30, %v794_v7 }
 0x368   :  { %3205 = vtanh.f32 %v960_v14 }
 0x372   :  { %v3206_v19 = vpop.eup %3205 }
 0x373   :  { %v963_v20 = vmul.f32 %v3206_v19, %v962_v9 }
 0x375   :  { %v968_v4 = vadd.f32 %v967_v13, %v963_v20 }
 0x377   :  { %v980_v24 = vrot.slane %v968_v4, 4  ;;  %v1020_v4 = vld [vmem:[#allocation3 + $0x10] sm:$0xc0] }
 0x379   :  { %v982_v29 = vmul.f32 %v980_v24, %v977_v27 }
 0x37b   :  { %v3728_v37 = vadd.f32 %v989_v36, %v982_v29  ;;  %v998_v38 = vrot.slane %v982_v29, %v3627_v56 }
 0x37d   :  { %v999_v41 = vcombine.high %v998_v38, %v998_v38  ;;  %2265 = vst.sshfl [vmem:[#allocation11 + $0x2] sm:$0x1 pattern:$0x73625140] %v998_v38  ;;  %1086 = vmatmul.mubr.f32.vlgmr.msra.gmra.mrb[6].mxu0 %v3728_v37  ;;  %2571 = vmatmul.mubr.f32.vlgmr.msra.gmra.mrb[6].mxu1 %v3728_v37  ;;  %v1191_v20 = vrot.slane %v3728_v37, 2 }
 0x37e   :  { %2940 = vmatpush1.bf16.msra.mxu0 %v3454_v10  ;;  %2971 = vmatpush3.bf16.msra.mxu1 %v3475_v31 }
 0x37f   :  { %2266 = vst.sshfl [vmem:[#allocation11 + $0xa] sm:$0x1 pattern:$0x73625140] %v999_v41  ;;  %2942 = vmatprep.subr.bf16.mxu0 %v3456_v11  ;;  %2972 = vmatprep.subr.bf16.mxu1 %v3372_v0 }
 0x380   :  { %1311 = vmatprep.mubr.f32.mxu0 %v3373_v1  ;;  %2605 = vmatprep.mubr.msk.f32.mxu1 %vm3374_vm0, %v3373_v1 }
 0x382   :  { %2944 = vmatpush1.bf16.msra.mxu0 %v3461_v16  ;;  %2974 = vmatpush3.bf16.msra.mxu1 %v3486_v39 }
 0x383   :  { %2946 = vmatprep.subr.bf16.mxu0 %v3465_v17  ;;  %2975 = vmatprep.subr.bf16.mxu1 %v3372_v0 }
 0x386   :  { %2948 = vmatpush1.bf16.msra.mxu0 %v3469_v22  ;;  %2977 = vmatpush3.bf16.msra.mxu1 %v3506_v51 }
 0x387   :  { %2950 = vmatprep.subr.bf16.mxu0 %v3473_v23  ;;  %2978 = vmatprep.subr.bf16.mxu1 %v3372_v0 }
 0x38a   :  { %2952 = vmatpush1.bf16.msra.mxu0 %v3480_v33  ;;  %2980 = vmatpush3.bf16.msra.mxu1 %v3523_v63 }
 0x38b   :  { %2954 = vmatprep.subr.bf16.mxu0 %v3483_v35  ;;  %2981 = vmatprep.subr.bf16.mxu1 %v3372_v0 }
 0x38e   :  { %2956 = vmatpush1.bf16.msra.mxu0 %v3495_v44  ;;  %2983 = vmatpush3.bf16.msra.mxu1 %v3537_v15 }
 0x38f   :  { %2958 = vmatprep.subr.bf16.mxu0 %v3503_v48  ;;  %2984 = vmatprep.subr.bf16.mxu1 %v3372_v0 }
 0x392   :  { %2960 = vmatpush1.bf16.msra.mxu0 %v3517_v58  ;;  %2986 = vmatpush3.bf16.msra.mxu1 %v3547_v25 }
 0x393   :  { %2962 = vmatprep.subr.bf16.mxu0 %v3520_v59  ;;  %2987 = vmatprep.subr.bf16.mxu1 %v3372_v0 }
 0x396   :  { %2964 = vmatpush1.bf16.msra.mxu0 %v3530_v8  ;;  %2989 = vmatpush3.bf16.msra.mxu1 %v3556_v32 }
 0x397   :  { %2966 = vmatprep.subr.bf16.mxu0 %v3534_v12  ;;  %2990 = vmatprep.subr.bf16.mxu1 %v3372_v0 }
 0x39a   :  { %2968 = vmatpush1.bf16.msra.mxu0 %v3542_v21  ;;  %2992 = vmatpush3.bf16.msra.mxu1 %v3566_v40 }
 0x39b   :  { %2994 = vmatprep.subr.bf16.mxu0 %v3452_v6  ;;  %3025 = vmatprep.subr.bf16.mxu1 %v3372_v0 }
 0x450   :  { %v1087_v45 = vpop.f32.mrb[6].mxu0  ;;  %v1158_v47 = vpop.f32.mrb[6].mxu1 }
 0x451   :  { %v1088_v46 = vadd.f32 %v1087_v45, %v3617_v57  ;;  %v1089_v49 = vpop.f32.mrb[7].mxu0  ;;  %v2572_v50 = vpop.f32.mrb[7].mxu1  ;;  %v1159_v14 = vadd.f32 %v1158_v47, %v3623_v26 }
 0x452   :  { %v1090_v54 = vadd.f32 %v1089_v49, %v3619_v60  ;;  %v1203_v45 = vpop.permute.xlu0 %1202 }
 0x453   :  { %v1163_v55 = vrot.slane %v1088_v46, 2  ;;  %v1183_v9 = vrot.slane %v1159_v14, 2  ;;  %v1213_v46 = vpop.permute.xlu1 %1212 }
 0x454   :  { %v1173_v62 = vrot.slane %v1090_v54, 2  ;;  %v1215_v47 = vmul.f32 %v1213_v46, %v3728_v37  ;;  %v214_v37 = vld [vmem:[%s213_s15] ss:$8 sm:$0x7]  ;;  %s2143_s15 = sshll.u32 %s3378_s14, 4  ;;  %s3927_s15 = int_to_ptr.vmem [resolvable:$true] %s2143_s15 }
 0x455   :  { %v1165_v2 = vadd.f32 %v1163_v55, %v1018_v52  ;;  %216 = vst.msk [vmem:[#allocation3 + $0x1a] ss:$8 sm:$0x7] %vm3490_vm1, %v214_v37  ;;  %v228_v55 = vld [vmem:[%s227_s16] ss:$8 sm:$0x7] }
 0x456   :  { %v1175_v3 = vadd.f32 %v1173_v62, %v1019_v61  ;;  %230 = vst.msk [vmem:[#allocation3 + $0x1b] ss:$8 sm:$0x7] %vm3490_vm1, %v228_v55  ;;  %v1244_v61 = vld [vmem:[#allocation3 + $0x18] sm:$0x3]  ;;  %s3313_s16 = scalar_lea.vmem %s2157_s4, 32 }
 0x457   :  { %v2267_v5 = vmul.f32 -1.442695, %v1165_v2  ;;  %p3314_p7 = scmp.ne.s32.totalorder %s2157_s4, %s3313_s16  ;;  %p3319_p9 = scmp.lt.s32.totalorder %s3313_s16, %s3313_s16 }
 0x458   :  { %v2268_v7 = vmul.f32 -1.442695, %v1175_v3 }
 0x459   :  { %3207 = vpow2.f32 %v2267_v5  ;;  %p3320_p10 = por %p3319_p9, %p3318_p8 }
 0x45a   :  { %3209 = vpow2.f32 %v2268_v7 }
 0x45b   :  { %p3321_p11 = pnand %p3320_p10, %p3314_p7 }
 0x463   :  { %v3208_v28 = vpop.eup %3207 }
 0x464   :  { %v3210_v53 = vpop.eup %3209  ;;  %v1169_v30 = vadd.f32 1.0, %v3208_v28 }
 0x465   :  { %v1179_v13 = vadd.f32 1.0, %v3210_v53 }
 0x466   :  { %3211 = vrcp.f32 %v1169_v30  ;;  %v1245_v30 = vld [vmem:[#allocation3 + $0x20] sm:$0x3] }
 0x467   :  { %3213 = vrcp.f32 %v1179_v13 }
 0x470   :  { %v3212_v19 = vpop.eup %3211 }
 0x471   :  { %v3214_v24 = vpop.eup %3213  ;;  %v1185_v27 = vmul.f32 %v3212_v19, %v1183_v9 }
 0x472   :  { %v1193_v34 = vmul.f32 %v3214_v24, %v1191_v20  ;;  %v1188_v29 = vsub.f32 1.0, %v3214_v24 }
 0x473   :  { %v1186_v36 = vadd.f32 %v1185_v27, %v1020_v4 }
 0x475   :  { %3215 = vtanh.f32 %v1186_v36  ;;  %v1246_v36 = vld [vmem:[#allocation3 + $0x28] sm:$0x3] }
 0x47f   :  { %v3216_v38 = vpop.eup %3215 }
 0x480   :  { %v1189_v41 = vmul.f32 %v3216_v38, %v1188_v29 }
 0x482   :  { %v1194_v18 = vadd.f32 %v1193_v34, %v1189_v41 }
 0x484   :  { %v1206_v42 = vrot.slane %v1194_v18, 6 }
 0x486   :  { %v1208_v49 = vmul.f32 %v1206_v42, %v1203_v45 }
 0x488   :  { %v3777_v50 = vadd.f32 %v1215_v47, %v1208_v49  ;;  %v1224_v52 = vrot.slane %v1208_v49, %v3627_v56  ;;  %v1417_v47 = vpop.permute.xlu0 %1416 }
 0x48a   :  { %v1225_v54 = vcombine.high %v1224_v52, %v1224_v52  ;;  %2271 = vst.sshfl [vmem:[#allocation11 + $0x3] sm:$0x1 pattern:$0x73625140] %v1224_v52  ;;  %1312 = vmatmul.mubr.f32.vlgmr.msra.gmra.mrb[8].mxu0 %v3777_v50  ;;  %2606 = vmatmul.mubr.f32.vlgmr.msra.gmra.mrb[8].mxu1 %v3777_v50  ;;  %v1424_v52 = vpop.permute.xlu1 %1423 }
 0x48b   :  { %2996 = vmatpush1.bf16.msra.mxu0 %v3454_v10  ;;  %3027 = vmatpush3.bf16.msra.mxu1 %v3475_v31  ;;  %v1426_v37 = vmul.f32 %v1424_v52, %v3777_v50 }
 0x48c   :  { %2272 = vst.sshfl [vmem:[#allocation11 + $0xb] sm:$0x1 pattern:$0x73625140] %v1225_v54  ;;  %2998 = vmatprep.subr.bf16.mxu0 %v3456_v11  ;;  %3028 = vmatprep.subr.bf16.mxu1 %v3372_v0 }
 0x48d   :  { %1522 = vmatprep.mubr.f32.mxu0 %v3373_v1  ;;  %2640 = vmatprep.mubr.msk.f32.mxu1 %vm3374_vm0, %v3373_v1 }
 0x48f   :  { %3000 = vmatpush1.bf16.msra.mxu0 %v3461_v16  ;;  %3030 = vmatpush3.bf16.msra.mxu1 %v3486_v39 }
 0x490   :  { %3002 = vmatprep.subr.bf16.mxu0 %v3465_v17  ;;  %3031 = vmatprep.subr.bf16.mxu1 %v3372_v0 }
 0x493   :  { %3004 = vmatpush1.bf16.msra.mxu0 %v3469_v22  ;;  %3033 = vmatpush3.bf16.msra.mxu1 %v3506_v51 }
 0x494   :  { %3006 = vmatprep.subr.bf16.mxu0 %v3473_v23  ;;  %3034 = vmatprep.subr.bf16.mxu1 %v3372_v0 }
 0x497   :  { %3008 = vmatpush1.bf16.msra.mxu0 %v3480_v33  ;;  %3036 = vmatpush3.bf16.msra.mxu1 %v3523_v63 }
 0x498   :  { %3010 = vmatprep.subr.bf16.mxu0 %v3483_v35  ;;  %3037 = vmatprep.subr.bf16.mxu1 %v3372_v0 }
 0x49b   :  { %3012 = vmatpush1.bf16.msra.mxu0 %v3495_v44  ;;  %3039 = vmatpush3.bf16.msra.mxu1 %v3537_v15 }
 0x49c   :  { %3014 = vmatprep.subr.bf16.mxu0 %v3503_v48  ;;  %3040 = vmatprep.subr.bf16.mxu1 %v3372_v0 }
 0x49f   :  { %3016 = vmatpush1.bf16.msra.mxu0 %v3517_v58  ;;  %3042 = vmatpush3.bf16.msra.mxu1 %v3547_v25 }
 0x4a0   :  { %3018 = vmatprep.subr.bf16.mxu0 %v3520_v59  ;;  %3043 = vmatprep.subr.bf16.mxu1 %v3372_v0 }
 0x4a3   :  { %3020 = vmatpush1.bf16.msra.mxu0 %v3530_v8  ;;  %3045 = vmatpush3.bf16.msra.mxu1 %v3556_v32 }
 0x4a4   :  { %3022 = vmatprep.subr.bf16.mxu0 %v3534_v12  ;;  %3046 = vmatprep.subr.bf16.mxu1 %v3372_v0 }
 0x4a7   :  { %3024 = vmatpush1.bf16.msra.mxu0 %v3542_v21  ;;  %3048 = vmatpush3.bf16.msra.mxu1 %v3566_v40 }
 0x4a8   :  { %3050 = vmatprep.subr.bf16.mxu0 %v3452_v6  ;;  %3081 = vmatprep.subr.bf16.mxu1 %v3372_v0 }
 0x55d   :  { %v1313_v62 = vpop.f32.mrb[8].mxu0  ;;  %v1384_v2 = vpop.f32.mrb[8].mxu1 }
 0x55e   :  { %v1314_v3 = vadd.f32 %v1313_v62, %v3617_v57  ;;  %v1315_v5 = vpop.f32.mrb[9].mxu0  ;;  %v2607_v7 = vpop.f32.mrb[9].mxu1  ;;  %v1385_v27 = vadd.f32 %v1384_v2, %v3623_v26  ;;  %v256_v2 = vld [vmem:[%s255_s26] ss:$8 sm:$0x7] }
 0x55f   :  { %v1316_v28 = vadd.f32 %v1315_v5, %v3619_v60  ;;  %258 = vst.msk [vmem:[#allocation3 + $0x1d] ss:$8 sm:$0x7] %vm3490_vm1, %v256_v2  ;;  %v1640_v2 = vpop.permute.xlu0 %1639 }
 0x560   :  { %v1388_v53 = vadd.f32 %v1314_v3, %v1244_v61 }
 0x561   :  { %v1395_v14 = vadd.f32 %v1316_v28, %v1245_v30 }
 0x562   :  { %v2273_v13 = vmul.f32 -1.442695, %v1388_v53  ;;  %v1455_v53 = vld [vmem:[#allocation3 + $0x18] sm:$0xc] }
 0x563   :  { %v2274_v9 = vmul.f32 -1.442695, %v1395_v14  ;;  %v1456_v14 = vld [vmem:[#allocation3 + $0x20] sm:$0xc] }
 0x564   :  { %3217 = vpow2.f32 %v2273_v13 }
 0x565   :  { %3219 = vpow2.f32 %v2274_v9 }
 0x56e   :  { %v3218_v19 = vpop.eup %3217 }
 0x56f   :  { %v1392_v20 = vadd.f32 1.0, %v3218_v19  ;;  %v3220_v4 = vpop.eup %3219 }
 0x570   :  { %v1399_v24 = vadd.f32 1.0, %v3220_v4 }
 0x571   :  { %3221 = vrcp.f32 %v1392_v20 }
 0x572   :  { %3223 = vrcp.f32 %v1399_v24 }
 0x57b   :  { %v3222_v34 = vpop.eup %3221 }
 0x57c   :  { %v1402_v29 = vmul.f32 %v3222_v34, %v1385_v27  ;;  %v3224_v41 = vpop.eup %3223 }
 0x57d   :  { %v1405_v18 = vsub.f32 1.0, %v3224_v41  ;;  %v1407_v46 = vmul.f32 %v3224_v41, %v3777_v50  ;;  %v242_v50 = vld [vmem:[%s241_s3] ss:$8 sm:$0x7] }
 0x57e   :  { %v1403_v38 = vadd.f32 %v1402_v29, %v1246_v36  ;;  %244 = vst.msk [vmem:[#allocation3 + $0x1c] ss:$8 sm:$0x7] %vm3490_vm1, %v242_v50 }
 0x580   :  { %3225 = vtanh.f32 %v1403_v38 }
 0x58a   :  { %v3226_v42 = vpop.eup %3225 }
 0x58b   :  { %v1406_v45 = vmul.f32 %v3226_v42, %v1405_v18 }
 0x58d   :  { %v1408_v49 = vadd.f32 %v1407_v46, %v1406_v45  ;;  %v1457_v45 = vld [vmem:[#allocation3 + $0x28] sm:$0xc] }
 0x58f   :  { %v1419_v54 = vmul.f32 %v1417_v47, %v1408_v49 }
 0x591   :  { %v3826_v55 = vadd.f32 %v1426_v37, %v1419_v54  ;;  %v1435_v61 = vrot.slane %v1419_v54, %v3627_v56 }
 0x593   :  { %v1436_v62 = vcombine.high %v1435_v61, %v1435_v61  ;;  %2277 = vst.sshfl [vmem:[#allocation11 + $0x4] sm:$0x1 pattern:$0x73625140] %v1435_v61  ;;  %1523 = vmatmul.mubr.f32.vlgmr.msra.gmra.mrb[10].mxu0 %v3826_v55  ;;  %2641 = vmatmul.mubr.f32.vlgmr.msra.gmra.mrb[10].mxu1 %v3826_v55  ;;  %v1628_v42 = vrot.slane %v3826_v55, 6 }
 0x594   :  { %3052 = vmatpush1.bf16.msra.mxu0 %v3454_v10  ;;  %3083 = vmatpush3.bf16.msra.mxu1 %v3475_v31 }
 0x595   :  { %2278 = vst.sshfl [vmem:[#allocation11 + $0xc] sm:$0x1 pattern:$0x73625140] %v1436_v62  ;;  %3054 = vmatprep.subr.bf16.mxu0 %v3456_v11  ;;  %3084 = vmatprep.subr.bf16.mxu1 %v3372_v0 }
 0x596   :  { %1748 = vmatprep.mubr.f32.mxu0 %v3373_v1  ;;  %2675 = vmatprep.mubr.msk.f32.mxu1 %vm3374_vm0, %v3373_v1 }
 0x598   :  { %3056 = vmatpush1.bf16.msra.mxu0 %v3461_v16  ;;  %3086 = vmatpush3.bf16.msra.mxu1 %v3486_v39 }
 0x599   :  { %3058 = vmatprep.subr.bf16.mxu0 %v3465_v17  ;;  %3087 = vmatprep.subr.bf16.mxu1 %v3372_v0 }
 0x59c   :  { %3060 = vmatpush1.bf16.msra.mxu0 %v3469_v22  ;;  %3089 = vmatpush3.bf16.msra.mxu1 %v3506_v51 }
 0x59d   :  { %3062 = vmatprep.subr.bf16.mxu0 %v3473_v23  ;;  %3090 = vmatprep.subr.bf16.mxu1 %v3372_v0 }
 0x5a0   :  { %3064 = vmatpush1.bf16.msra.mxu0 %v3480_v33  ;;  %3092 = vmatpush3.bf16.msra.mxu1 %v3523_v63 }
 0x5a1   :  { %3066 = vmatprep.subr.bf16.mxu0 %v3483_v35  ;;  %3093 = vmatprep.subr.bf16.mxu1 %v3372_v0 }
 0x5a4   :  { %3068 = vmatpush1.bf16.msra.mxu0 %v3495_v44  ;;  %3095 = vmatpush3.bf16.msra.mxu1 %v3537_v15 }
 0x5a5   :  { %3070 = vmatprep.subr.bf16.mxu0 %v3503_v48  ;;  %3096 = vmatprep.subr.bf16.mxu1 %v3372_v0 }
 0x5a8   :  { %3072 = vmatpush1.bf16.msra.mxu0 %v3517_v58  ;;  %3098 = vmatpush3.bf16.msra.mxu1 %v3547_v25 }
 0x5a9   :  { %3074 = vmatprep.subr.bf16.mxu0 %v3520_v59  ;;  %3099 = vmatprep.subr.bf16.mxu1 %v3372_v0 }
 0x5ac   :  { %3076 = vmatpush1.bf16.msra.mxu0 %v3530_v8  ;;  %3101 = vmatpush3.bf16.msra.mxu1 %v3556_v32 }
 0x5ad   :  { %3078 = vmatprep.subr.bf16.mxu0 %v3534_v12  ;;  %3102 = vmatprep.subr.bf16.mxu1 %v3372_v0 }
 0x5b0   :  { %3080 = vmatpush1.bf16.msra.mxu0 %v3542_v21  ;;  %3104 = vmatpush3.bf16.msra.mxu1 %v3566_v40 }
 0x5b1   :  { %3106 = vmatprep.subr.bf16.mxu0 %v3452_v6  ;;  %3137 = vmatprep.subr.bf16.mxu1 %v3372_v0 }
 0x666   :  { %v1524_v6 = vpop.f32.mrb[10].mxu0  ;;  %v1595_v3 = vpop.f32.mrb[10].mxu1 }
 0x667   :  { %v1525_v5 = vadd.f32 %v1524_v6, %v3617_v57  ;;  %v1526_v7 = vpop.f32.mrb[11].mxu0  ;;  %v2642_v28 = vpop.f32.mrb[11].mxu1  ;;  %v1596_v38 = vadd.f32 %v1595_v3, %v3623_v26 }
 0x668   :  { %v1527_v30 = vadd.f32 %v1526_v7, %v3619_v60  ;;  %v1650_v6 = vpop.permute.xlu1 %1649 }
 0x669   :  { %v1600_v13 = vrot.slane %v1525_v5, 6  ;;  %v1620_v41 = vrot.slane %v1596_v38, 6  ;;  %v1652_v3 = vmul.f32 %v1650_v6, %v3826_v55 }
 0x66a   :  { %v1610_v9 = vrot.slane %v1527_v30, 6 }
 0x66b   :  { %v1602_v19 = vadd.f32 %v1600_v13, %v1455_v53 }
 0x66c   :  { %v1612_v20 = vadd.f32 %v1610_v9, %v1456_v14 }
 0x66d   :  { %v2279_v4 = vmul.f32 -1.442695, %v1602_v19 }
 0x66e   :  { %v2280_v24 = vmul.f32 -1.442695, %v1612_v20 }
 0x66f   :  { %3227 = vpow2.f32 %v2279_v4 }
 0x670   :  { %3229 = vpow2.f32 %v2280_v24  ;;  %v1866_v24 = vpop.permute.xlu0 %1865 }
 0x679   :  { %v3228_v27 = vpop.eup %3227 }
 0x67a   :  { %v3230_v34 = vpop.eup %3229  ;;  %v1606_v36 = vadd.f32 1.0, %v3228_v27  ;;  %v1876_v27 = vpop.permute.xlu1 %1875 }
 0x67b   :  { %v1616_v29 = vadd.f32 1.0, %v3230_v34 }
 0x67c   :  { %3231 = vrcp.f32 %v1606_v36 }
 0x67d   :  { %3233 = vrcp.f32 %v1616_v29 }
 0x686   :  { %v3232_v18 = vpop.eup %3231 }
 0x687   :  { %v3234_v46 = vpop.eup %3233  ;;  %v1622_v49 = vmul.f32 %v3232_v18, %v1620_v41 }
 0x688   :  { %v1630_v47 = vmul.f32 %v3234_v46, %v1628_v42  ;;  %v1625_v54 = vsub.f32 1.0, %v3234_v46 }
 0x689   :  { %v1623_v52 = vadd.f32 %v1622_v49, %v1457_v45 }
 0x68b   :  { %3235 = vtanh.f32 %v1623_v52 }
 0x695   :  { %v3236_v37 = vpop.eup %3235 }
 0x696   :  { %v1626_v61 = vmul.f32 %v3236_v37, %v1625_v54 }
 0x698   :  { %v1631_v62 = vadd.f32 %v1630_v47, %v1626_v61 }
 0x69a   :  { %v1643_v50 = vrot.slane %v1631_v62, 2 }
 0x69c   :  { %v1645_v5 = vmul.f32 %v1643_v50, %v1640_v2 }
 0x69e   :  { %v3875_v7 = vadd.f32 %v1652_v3, %v1645_v5  ;;  %v1661_v28 = vrot.slane %v1645_v5, %v3627_v56 }
 0x6a0   :  { %v1662_v53 = vcombine.high %v1661_v28, %v1661_v28  ;;  %2283 = vst.sshfl [vmem:[#allocation11 + $0x5] sm:$0x1 pattern:$0x73625140] %v1661_v28  ;;  %1749 = vmatmul.mubr.f32.vlgmr.msra.gmra.mrb[12].mxu0 %v3875_v7  ;;  %2676 = vmatmul.mubr.f32.vlgmr.msra.gmra.mrb[12].mxu1 %v3875_v7  ;;  %v1878_v36 = vmul.f32 %v1876_v27, %v3875_v7 }
 0x6a1   :  { %3108 = vmatpush1.bf16.msra.mxu0 %v3454_v10  ;;  %3139 = vmatpush3.bf16.msra.mxu1 %v3475_v31 }
 0x6a2   :  { %2284 = vst.sshfl [vmem:[#allocation11 + $0xd] sm:$0x1 pattern:$0x73625140] %v1662_v53  ;;  %3110 = vmatprep.subr.bf16.mxu0 %v3456_v11  ;;  %3140 = vmatprep.subr.bf16.mxu1 %v3372_v0 }
 0x6a3   :  { %1974 = vmatprep.mubr.f32.mxu0 %v3373_v1  ;;  %2710 = vmatprep.mubr.msk.f32.mxu1 %vm3374_vm0, %v3373_v1  ;;  %v270_v1 = vld [vmem:[%s269_s11] ss:$8 sm:$0x7] }
 0x6a4   :  { %272 = vst.msk [vmem:[#allocation3 + $0x1e] ss:$8 sm:$0x7] %vm3490_vm1, %v270_v1 }
 0x6a5   :  { %3112 = vmatpush1.bf16.msra.mxu0 %v3461_v16  ;;  %3142 = vmatpush3.bf16.msra.mxu1 %v3486_v39 }
 0x6a6   :  { %3114 = vmatprep.subr.bf16.mxu0 %v3465_v17  ;;  %3143 = vmatprep.subr.bf16.mxu1 %v3372_v0 }
 0x6a9   :  { %3116 = vmatpush1.bf16.msra.mxu0 %v3469_v22  ;;  %3145 = vmatpush3.bf16.msra.mxu1 %v3506_v51 }
 0x6aa   :  { %3118 = vmatprep.subr.bf16.mxu0 %v3473_v23  ;;  %3146 = vmatprep.subr.bf16.mxu1 %v3372_v0  ;;  %v1681_v23 = vld [vmem:[#allocation3 + $0x18] sm:$0x30] }
 0x6ad   :  { %3120 = vmatpush1.bf16.msra.mxu0 %v3480_v33  ;;  %3148 = vmatpush3.bf16.msra.mxu1 %v3523_v63 }
 0x6ae   :  { %3122 = vmatprep.subr.bf16.mxu0 %v3483_v35  ;;  %3149 = vmatprep.subr.bf16.mxu1 %v3372_v0  ;;  %v1682_v35 = vld [vmem:[#allocation3 + $0x20] sm:$0x30] }
 0x6b1   :  { %3124 = vmatpush1.bf16.msra.mxu0 %v3495_v44  ;;  %3151 = vmatpush3.bf16.msra.mxu1 %v3537_v15 }
 0x6b2   :  { %3126 = vmatprep.subr.bf16.mxu0 %v3503_v48  ;;  %3152 = vmatprep.subr.bf16.mxu1 %v3372_v0 }
 0x6b5   :  { %3128 = vmatpush1.bf16.msra.mxu0 %v3517_v58  ;;  %3154 = vmatpush3.bf16.msra.mxu1 %v3547_v25  ;;  %v1854_v25 = vrot.slane %v3875_v7, 4 }
 0x6b6   :  { %3130 = vmatprep.subr.bf16.mxu0 %v3520_v59  ;;  %3155 = vmatprep.subr.bf16.mxu1 %v3372_v0 }
 0x6b9   :  { %3132 = vmatpush1.bf16.msra.mxu0 %v3530_v8  ;;  %3157 = vmatpush3.bf16.msra.mxu1 %v3556_v32  ;;  %v1683_v32 = vld [vmem:[#allocation3 + $0x28] sm:$0x30] }
 0x6ba   :  { %3134 = vmatprep.subr.bf16.mxu0 %v3534_v12  ;;  %3158 = vmatprep.subr.bf16.mxu1 %v3372_v0  ;;  %v284_v0 = vld [vmem:[%s283_s12] ss:$8 sm:$0x7] }
 0x6bb   :  { %286 = vst.msk [vmem:[#allocation3 + $0x1f] ss:$8 sm:$0x7] %vm3490_vm1, %v284_v0 }
 0x6bd   :  { %3136 = vmatpush1.bf16.msra.mxu0 %v3542_v21  ;;  %3160 = vmatpush3.bf16.msra.mxu1 %v3566_v40 }
 0x6c2   :  { %v1907_v47 = vld [vmem:[#allocation3 + $0x18] sm:$0xc0]  ;;  %v1908_v37 = vld [vmem:[#allocation3 + $0x20] sm:$0xc0]  ;;  %v1909_v0 = vld [vmem:[#allocation3 + $0x28] sm:$0xc0] }
 0x773   :  { %v1750_v10 = vpop.f32.mrb[12].mxu0  ;;  %v1821_v11 = vpop.f32.mrb[12].mxu1 }
 0x774   :  { %v1751_v16 = vadd.f32 %v1750_v10, %v3617_v57  ;;  %v1752_v17 = vpop.f32.mrb[13].mxu0  ;;  %v2677_v22 = vpop.f32.mrb[13].mxu1  ;;  %v1822_v12 = vadd.f32 %v1821_v11, %v3623_v26 }
 0x775   :  { %v1753_v31 = vadd.f32 %v1752_v17, %v3619_v60 }
 0x776   :  { %v1826_v33 = vrot.slane %v1751_v16, 4  ;;  %v1846_v15 = vrot.slane %v1822_v12, 4 }
 0x777   :  { %v1836_v39 = vrot.slane %v1753_v31, 4 }
 0x778   :  { %v1828_v44 = vadd.f32 %v1826_v33, %v1681_v23 }
 0x779   :  { %v1838_v48 = vadd.f32 %v1836_v39, %v1682_v35  ;;  %v2092_v39 = vpop.permute.xlu0 %2091 }
 0x77a   :  { %v2285_v51 = vmul.f32 -1.442695, %v1828_v44  ;;  %v2102_v44 = vpop.permute.xlu1 %2101 }
 0x77b   :  { %v2286_v58 = vmul.f32 -1.442695, %v1838_v48 }
 0x77c   :  { %3237 = vpow2.f32 %v2285_v51 }
 0x77d   :  { %3239 = vpow2.f32 %v2286_v58 }
 0x786   :  { %v3238_v43 = vpop.eup %3237 }
 0x787   :  { %v3240_v59 = vpop.eup %3239  ;;  %v1832_v63 = vadd.f32 1.0, %v3238_v43 }
 0x788   :  { %v1842_v8 = vadd.f32 1.0, %v3240_v59 }
 0x789   :  { %3241 = vrcp.f32 %v1832_v63 }
 0x78a   :  { %3243 = vrcp.f32 %v1842_v8 }
 0x793   :  { %v3242_v21 = vpop.eup %3241 }
 0x794   :  { %v3244_v40 = vpop.eup %3243  ;;  %v1848_v55 = vmul.f32 %v3242_v21, %v1846_v15 }
 0x795   :  { %v1856_v30 = vmul.f32 %v3244_v40, %v1854_v25  ;;  %v1851_v14 = vsub.f32 1.0, %v3244_v40 }
 0x796   :  { %v1849_v13 = vadd.f32 %v1848_v55, %v1683_v32 }
 0x798   :  { %3245 = vtanh.f32 %v1849_v13 }
 0x7a2   :  { %v3246_v9 = vpop.eup %3245 }
 0x7a3   :  { %v1852_v19 = vmul.f32 %v3246_v9, %v1851_v14 }
 0x7a5   :  { %v1857_v20 = vadd.f32 %v1856_v30, %v1852_v19 }
 0x7a7   :  { %v1869_v4 = vrot.slane %v1857_v20, 4 }
 0x7a9   :  { %v1871_v34 = vmul.f32 %v1869_v4, %v1866_v24 }
 0x7ab   :  { %v1879_v29 = vadd.f32 %v1878_v36, %v1871_v34  ;;  %v1887_v38 = vrot.slane %v1871_v34, %v3627_v56 }
 0x7ad   :  { %v1888_v41 = vcombine.high %v1887_v38, %v1887_v38  ;;  %2289 = vst.sshfl [vmem:[#allocation11 + $0x6] sm:$0x1 pattern:$0x73625140] %v1887_v38  ;;  %1975 = vmatmul.mubr.f32.vlgmr.msra.gmra.mrb[14].mxu0 %v1879_v29  ;;  %2711 = vmatmul.mubr.f32.vlgmr.msra.gmra.mrb[14].mxu1 %v1879_v29 }
 0x7af   :  { %2290 = vst.sshfl [vmem:[#allocation11 + $0xe] sm:$0x1 pattern:$0x73625140] %v1888_v41 }
 0x880   :  { %v1976_v18 = vpop.f32.mrb[14].mxu0  ;;  %v2047_v42 = vpop.f32.mrb[14].mxu1 }
 0x881   :  { %v1977_v45 = vadd.f32 %v1976_v18, %v3617_v57  ;;  %v1978_v46 = vpop.f32.mrb[15].mxu0  ;;  %v2712_v49 = vpop.f32.mrb[15].mxu1  ;;  %v2048_v57 = vadd.f32 %v2047_v42, %v3623_v26  ;;  %v2104_v26 = vmul.f32 %v2102_v44, %v1879_v29 }
 0x882   :  { %v1979_v52 = vadd.f32 %v1978_v46, %v3619_v60  ;;  %v2080_v60 = vrot.slane %v1879_v29, 2 }
 0x883   :  { %v2052_v54 = vrot.slane %v1977_v45, 2  ;;  %v2072_v53 = vrot.slane %v2048_v57, 2 }
 0x884   :  { %v2062_v61 = vrot.slane %v1979_v52, 2 }
 0x885   :  { %v2054_v62 = vadd.f32 %v2052_v54, %v1907_v47 }
 0x886   :  { %v2064_v50 = vadd.f32 %v2062_v61, %v1908_v37 }
 0x887   :  { %v2291_v2 = vmul.f32 -1.442695, %v2054_v62 }
 0x888   :  { %v2292_v6 = vmul.f32 -1.442695, %v2064_v50 }
 0x889   :  { %3247 = vpow2.f32 %v2291_v2 }
 0x88a   :  { %3249 = vpow2.f32 %v2292_v6 }
 0x893   :  { %v3248_v5 = vpop.eup %3247 }
 0x894   :  { %v3250_v3 = vpop.eup %3249  ;;  %v2058_v7 = vadd.f32 1.0, %v3248_v5 }
 0x895   :  { %v2068_v28 = vadd.f32 1.0, %v3250_v3 }
 0x896   :  { %3251 = vrcp.f32 %v2058_v7 }
 0x897   :  { %3253 = vrcp.f32 %v2068_v28 }
 0x8a0   :  { %v3252_v1 = vpop.eup %3251 }
 0x8a1   :  { %v3254_v10 = vpop.eup %3253  ;;  %v2074_v11 = vmul.f32 %v3252_v1, %v2072_v53 }
 0x8a2   :  { %v2082_v16 = vmul.f32 %v3254_v10, %v2080_v60  ;;  %v2077_v22 = vsub.f32 1.0, %v3254_v10 }
 0x8a3   :  { %v2075_v17 = vadd.f32 %v2074_v11, %v1909_v0 }
 0x8a5   :  { %3255 = vtanh.f32 %v2075_v17 }
 0x8af   :  { %v3256_v23 = vpop.eup %3255 }
 0x8b0   :  { %v2078_v31 = vmul.f32 %v3256_v23, %v2077_v22 }
 0x8b2   :  { %v2083_v33 = vadd.f32 %v2082_v16, %v2078_v31 }
 0x8b4   :  { %v2095_v35 = vrot.slane %v2083_v33, 6 }
 0x8b6   :  { %v2097_v48 = vmul.f32 %v2095_v35, %v2092_v39 }
 0x8b8   :  { %v2113_v51 = vrot.slane %v2097_v48, %v3627_v56  ;;  %v2105_v58 = vadd.f32 %v2104_v26, %v2097_v48 }
 0x8ba   :  { %v2114_v43 = vcombine.high %v2113_v51, %v2113_v51  ;;  %2295 = vst.sshfl [vmem:[#allocation11 + $0x7] sm:$0x1 pattern:$0x73625140] %v2113_v51  ;;  %2133 = vst [vmem:[#allocation2] sm:$0x3] %v2105_v58 }
 0x8bb   :  { %2137 = vst [vmem:[#allocation12] sm:$0x3] %v2105_v58 }
 0x8bc   :  { %3324 = shalt.err (!%p3321_p11)
}
 0x8bd   :  { %s3325_s19 = scalar_lea.hbm %s3964_s6, 32 }
 0x8be   :  { %p3326_p12 = scmp.ne.s32.totalorder %s3964_s6, %s3325_s19  ;;  %p3329_p13 = scmp.lt.u32.totalorder %s3325_s19, %s3964_s6 }
 0x8c0   :  { %p3331_p0 = pnand %p3329_p13, %p3326_p12 }
 0x8c2   :  { %3334 = shalt.err (!%p3331_p0)
}
 0x8c3   :  { %2159 = dma.vmem_to_hbm [thread:$0]  %s2157_s4, 32, %s3964_s6, [#allocation13]   ;;  %2296 = vst.sshfl [vmem:[#allocation11 + $0xf] sm:$0x1 pattern:$0x73625140] %v2114_v43 }
 0x8c4   :  { %s3335_s25 = scalar_lea.vmem %s3927_s15, 256  ;;  %p3340_p2 = scmp.lt.s32.totalorder %s3927_s15, %s3927_s15 }
 0x8c5   :  { %p3336_p1 = scmp.ne.s32.totalorder %s3927_s15, %s3335_s25  ;;  %p3341_p3 = scmp.lt.s32.totalorder %s3335_s25, %s3335_s25 }
 0x8c7   :  { %p3342_p4 = por %p3341_p3, %p3340_p2 }
 0x8c9   :  { %p3343_p5 = pnand %p3342_p4, %p3336_p1 }
 0x8cb   :  { %3346 = shalt.err (!%p3343_p5)
}
 0x8cc   :  { %s3347_s2 = scalar_lea.hbm %s3963_s5, 256 }
 0x8cd   :  { %p3348_p6 = scmp.ne.s32.totalorder %s3963_s5, %s3347_s2  ;;  %p3351_p7 = scmp.lt.u32.totalorder %s3347_s2, %s3963_s5 }
 0x8cf   :  { %p3353_p8 = pnand %p3351_p7, %p3348_p6 }
 0x8d1   :  { %3356 = shalt.err (!%p3353_p8)
}
 0x8d2   :  { %s3379_s6 = smov 128   ;;  %s3380_s30 = smov 8  }
 0x8d3   :  { %2149 = dma.vmem_to_hbm [thread:$0]  %s3927_s15, 256, %s3963_s5, [#allocation8], %s3379_s6, %s3379_s6, %s3380_s30  }
 0x8d4   :  { %3363 = dma.done.wait [#allocation8], 256  }
 0x8d5   :  { %3364 = vsyncadd [#allocation8], 4294967040 }
 0x8d6   :  { %3365 = dma.done.wait [#allocation13], 32  }
 0x8d7   :  { %3366 = vsyncadd [#allocation13], 4294967264 }
 0x8d8   :  { %2166 = vsyncpa [#allocation7], 1 }
 0x8d9   :  { %2167 = vsyncpa [#allocation10], 1 }
 0x8da   :  { %2168 = vsyncpa [#allocation8], 1 }
 0x8db   :  { %2169 = vsyncpa [#allocation13], 1 }

</bundles_post_ra>
